<compile_context>
chip_gen: v5e
topology: v5e:2x2
jax: 0.10.0
libtpu: 0.0.40
codegen_flags: <defaults>
</compile_context>

<pallas_src>
import functools
import math

import numpy as np
import jax
import jax.numpy as jnp
from jax.experimental import pallas as pl
from jax.experimental.pallas import tpu as pltpu


def get_attn_mask(N, w):
    """Port of the PyTorch banded mask builder. Returns (N, N) float32 of 0/1."""
    mask = np.zeros((N, N), dtype=np.float32)
    for i in range(N):
        if i <= w:
            mask[i, 0:i + w + 1] = 1
        elif N - i <= w:
            mask[i, i - w:N] = 1
        else:
            mask[i, i:i + w + 1] = 1
            mask[i, i - w:i] = 1
    return jnp.asarray(mask)


def _mask_width_for_epoch(epoch):
    if epoch < 22:
        return 4
    elif epoch < 32:
        return 6
    elif epoch < 42:
        return 8
    else:
        return 10


def _choose_batch_block(B, N, num_heads):
    """Largest divisor of B that keeps the per-step unroll count / block modest."""
    best = 1
    for bb in range(1, B + 1):
        if B % bb != 0:
            continue
        if bb * N <= 1024 and bb * num_heads <= 64:
            best = bb
    return best


def _attention_kernel(x_ref, wq_ref, wk_ref, wv_ref, wproj_ref, bproj_ref,
                      o_ref, merged_ref, *, seq_len, num_heads, scale, mask_w):
    # x_ref:     (BB*N, C)   rows of BB batch elements, flattened
    # wq/wk/wv:  (C, C)      pre-transposed, pre-split qkv weight
    # wproj_ref: (C, C)      pre-transposed proj weight
    # bproj_ref: (1, C)      proj bias
    # o_ref:     (BB*N, C)
    # merged_ref:(BB*N, C)   VMEM scratch holding merged head outputs
    rows, C = x_ref.shape
    N = seq_len
    BB = rows // N
    D = C // num_heads

    x = x_ref[...]

    # Three lane-contiguous projections (bias-free qkv, per the module).
    # Scale is folded into q once instead of scaling every (N, N) score matrix.
    q = jnp.dot(x, wq_ref[...], preferred_element_type=jnp.float32) * scale
    k = jnp.dot(x, wk_ref[...], preferred_element_type=jnp.float32)
    v = jnp.dot(x, wv_ref[...], preferred_element_type=jnp.float32)

    if mask_w is not None:
        # The PyTorch banded mask is exactly |i - j| <= w; build it once, in-kernel,
        # as an additive bias (0 where allowed, -1e9 where masked).
        ri = jax.lax.broadcasted_iota(jnp.int32, (N, N), 0)
        ci = jax.lax.broadcasted_iota(jnp.int32, (N, N), 1)
        bias = jnp.where(jnp.abs(ri - ci) <= mask_w,
                         jnp.float32(0.0), jnp.float32(-1e9))

    for b in range(BB):                      # static unrolled loops (tiny shapes)
        r0 = b * N
        for h in range(num_heads):
            c0 = h * D
            qh = q[r0:r0 + N, c0:c0 + D]     # (N, D)
            kh = k[r0:r0 + N, c0:c0 + D]     # (N, D)
            vh = v[r0:r0 + N, c0:c0 + D]     # (N, D)

            # Q @ K^T without materializing a transpose: contract last dims of both.
            s = jax.lax.dot_general(qh, kh, (((1,), (1,)), ((), ())),
                                    preferred_element_type=jnp.float32)  # (N, N)
            if mask_w is not None:
                s = s + bias

            # Numerically-stable softmax along the last dim.
            m = jnp.max(s, axis=-1, keepdims=True)
            p = jnp.exp(s - m)
            p = p * pl.reciprocal(jnp.sum(p, axis=-1, keepdims=True), approx=True)

            # Write this head's output straight into the merged slab.
            merged_ref[r0:r0 + N, c0:c0 + D] = jnp.dot(
                p, vh, preferred_element_type=jnp.float32)

    y = jnp.dot(merged_ref[...], wproj_ref[...],
                preferred_element_type=jnp.float32) + bproj_ref[...]
    o_ref[...] = y.astype(o_ref.dtype)


def attention_forward(x, w_qkv, w_proj, b_proj, *, num_heads, is_mask, epoch):
    """x: (B, N, C) f32. w_qkv: (3C, C) PyTorch layout. w_proj: (C, C). b_proj: (C,)."""
    B, N, C = x.shape
    D = C // num_heads
    scale = D ** (-0.5)

    # epoch -> mask selection, mirroring the PyTorch forward.
    use_mask = bool(is_mask) and (epoch < 60)
    mask_w = _mask_width_for_epoch(epoch) if use_mask else None

    # Host-side (free) weight prep: transpose once, split fused QKV into 3 matmuls.
    wqkv_t = w_qkv.T                    # (C, 3C): columns = [q | k | v], head-major
    wq_t = wqkv_t[:, 0:C]
    wk_t = wqkv_t[:, C:2 * C]
    wv_t = wqkv_t[:, 2 * C:3 * C]
    wproj_t = w_proj.T                  # (C, C)
    bproj_2d = b_proj[None, :]          # (1, C)

    BB = _choose_batch_block(B, N, num_heads)
    grid = (B // BB,)
    block_rows = BB * N

    x2d = x.reshape(B * N, C)

    kernel = functools.partial(
        _attention_kernel, seq_len=N, num_heads=num_heads,
        scale=scale, mask_w=mask_w)

    # Explicit VMEM budget: double-buffered ins/outs + scratch, plus headroom,
    # clamped to stay within every generation's scoped default/physical limits.
    itm = 4  # f32
    block_bytes = (2 * block_rows * C * itm        # x block
                   + 2 * 4 * C * C * itm           # wq, wk, wv, wproj
                   + 2 * C * itm                   # proj bias
                   + 2 * block_rows * C * itm      # output block
                   + block_rows * C * itm)         # merged scratch
    vmem_limit = int(min(max(4 * block_bytes + (8 << 20), 32 << 20), 64 << 20))

    out2d = pl.pallas_call(
        kernel,
        out_shape=jax.ShapeDtypeStruct((B * N, C), x.dtype),
        grid_spec=pltpu.PrefetchScalarGridSpec(
            num_scalar_prefetch=0,
            grid=grid,
            in_specs=[
                pl.BlockSpec((block_rows, C), lambda i: (i, 0)),   # x rows
                pl.BlockSpec((C, C), lambda i: (0, 0)),            # wq
                pl.BlockSpec((C, C), lambda i: (0, 0)),            # wk
                pl.BlockSpec((C, C), lambda i: (0, 0)),            # wv
                pl.BlockSpec((C, C), lambda i: (0, 0)),            # wproj
                pl.BlockSpec((1, C), lambda i: (0, 0)),            # bproj
            ],
            out_specs=pl.BlockSpec((block_rows, C), lambda i: (i, 0)),
            scratch_shapes=[pltpu.VMEM((block_rows, C), jnp.float32)],
        ),
        compiler_params=pltpu.CompilerParams(
            dimension_semantics=("parallel",),
            vmem_limit_bytes=vmem_limit),
    )(x2d, wq_t, wk_t, wv_t, wproj_t, bproj_2d)

    return out2d.reshape(B, N, C)


def attention_reference(x, w_qkv, w_proj, b_proj, *, num_heads, is_mask, epoch):
    """Pure-JAX reference mirroring the PyTorch forward, for verification."""
    B, N, C = x.shape
    D = C // num_heads
    scale = D ** (-0.5)
    qkv = x @ w_qkv.T                                  # (B, N, 3C) (bias=False)
    qkv = qkv.reshape(B, N, 3, num_heads, D).transpose(2, 0, 3, 1, 4)
    q, k, v = qkv[0], qkv[1], qkv[2]                   # (B, H, N, D)
    attn = jnp.einsum('bhnd,bhmd->bhnm', q, k) * scale
    if is_mask and epoch < 60:
        w = _mask_width_for_epoch(epoch)
        mask = get_attn_mask(N, w)[None, None]
        attn = jnp.where(mask == 0, -1e9, attn)
    attn = jax.nn.softmax(attn, axis=-1)
    out = jnp.einsum('bhnm,bhmd->bhnd', attn, v)       # (B, H, N, D)
    out = out.transpose(0, 2, 1, 3).reshape(B, N, C)
    return out @ w_proj.T + b_proj


if __name__ == "__main__":
    B, N, C = 2, 8, 32
    num_heads = 8
    is_mask = N          # enable band-mask path (module's is_mask arg)
    epoch = 10           # -> mask_4 branch

    key = jax.random.PRNGKey(0)
    kx, kqkv, kproj, kb = jax.random.split(key, 4)

    x = jax.random.normal(kx, (B, N, C), dtype=jnp.float32)
    # Deterministic "nn.Linear"-style init (uniform, bound = 1/sqrt(fan_in))
    bound = 1.0 / math.sqrt(C)
    w_qkv = jax.random.uniform(kqkv, (3 * C, C), minval=-bound, maxval=bound, dtype=jnp.float32)
    w_proj = jax.random.uniform(kproj, (C, C), minval=-bound, maxval=bound, dtype=jnp.float32)
    b_proj = jax.random.uniform(kb, (C,), minval=-bound, maxval=bound, dtype=jnp.float32)

    # Masked path (epoch < 60)
    out = attention_forward(x, w_qkv, w_proj, b_proj,
                            num_heads=num_heads, is_mask=is_mask, epoch=epoch)
    out = jax.block_until_ready(out)
    ref = attention_reference(x, w_qkv, w_proj, b_proj,
                              num_heads=num_heads, is_mask=is_mask, epoch=epoch)
    np.testing.assert_allclose(np.asarray(out), np.asarray(ref), rtol=2e-3, atol=2e-3)

    # Unmasked path (epoch >= 60)
    out2 = attention_forward(x, w_qkv, w_proj, b_proj,
                             num_heads=num_heads, is_mask=is_mask, epoch=70)
    out2 = jax.block_until_ready(out2)
    ref2 = attention_reference(x, w_qkv, w_proj, b_proj,
                               num_heads=num_heads, is_mask=is_mask, epoch=70)
    np.testing.assert_allclose(np.asarray(out2), np.asarray(ref2), rtol=2e-3, atol=2e-3)

    print("KERNEL_OK")
</pallas_src>

<mosaic_0001>
module attributes {stable_mosaic.version = 11 : i64} {
  func.func @_attention_kernel(%arg0: i32, %arg1: memref<16x32xf32, #tpu.memory_space<vmem>>, %arg2: memref<32x32xf32, #tpu.memory_space<vmem>>, %arg3: memref<32x32xf32, #tpu.memory_space<vmem>>, %arg4: memref<32x32xf32, #tpu.memory_space<vmem>>, %arg5: memref<32x32xf32, #tpu.memory_space<vmem>>, %arg6: memref<1x32xf32, #tpu.memory_space<vmem>>, %arg7: memref<16x32xf32, #tpu.memory_space<vmem>>, %arg8: memref<16x32xf32, #tpu.memory_space<vmem>>) attributes {dimension_semantics = [#tpu.dimension_semantics<parallel>], iteration_bounds = array<i64: 1>, scalar_prefetch = 0 : i64, scratch_operands = 1 : i64, tpu.core_type = #tpu.core_type<tc>, window_params = [{transform_indices = @transform_0, window_bounds = array<i64: 16, 32>}, {pipeline_mode = #tpu.pipeline_mode<synchronous>, transform_indices = @transform_1, window_bounds = array<i64: 32, 32>}, {pipeline_mode = #tpu.pipeline_mode<synchronous>, transform_indices = @transform_2, window_bounds = array<i64: 32, 32>}, {pipeline_mode = #tpu.pipeline_mode<synchronous>, transform_indices = @transform_3, window_bounds = array<i64: 32, 32>}, {pipeline_mode = #tpu.pipeline_mode<synchronous>, transform_indices = @transform_4, window_bounds = array<i64: 32, 32>}, {pipeline_mode = #tpu.pipeline_mode<synchronous>, transform_indices = @transform_5, window_bounds = array<i64: 1, 32>}, {transform_indices = @transform_6, window_bounds = array<i64: 16, 32>}]} {
    %c0 = arith.constant 0 : index
    %c0_0 = arith.constant 0 : index
    %0 = vector.load %arg1[%c0, %c0_0] : memref<16x32xf32, #tpu.memory_space<vmem>>, vector<16x32xf32>
    %c0_1 = arith.constant 0 : index
    %c0_2 = arith.constant 0 : index
    %1 = vector.load %arg2[%c0_1, %c0_2] : memref<32x32xf32, #tpu.memory_space<vmem>>, vector<32x32xf32>
    %cst = arith.constant dense<0.000000e+00> : vector<16x32xf32>
    %2 = tpu.matmul %0, %1, %cst {dimension_numbers = #tpu.dot_dimension_numbers<[1], [0], [0], [1], [0, 0, 1, 1], [], []>} : vector<16x32xf32>, vector<32x32xf32>, vector<16x32xf32> -> vector<16x32xf32>
    %cst_3 = arith.constant 5.000000e-01 : f32
    %3 = vector.broadcast %cst_3 : f32 to vector<16x32xf32>
    %4 = arith.mulf %2, %3 : vector<16x32xf32>
    %c0_4 = arith.constant 0 : index
    %c0_5 = arith.constant 0 : index
    %5 = vector.load %arg3[%c0_4, %c0_5] : memref<32x32xf32, #tpu.memory_space<vmem>>, vector<32x32xf32>
    %cst_6 = arith.constant dense<0.000000e+00> : vector<16x32xf32>
    %6 = tpu.matmul %0, %5, %cst_6 {dimension_numbers = #tpu.dot_dimension_numbers<[1], [0], [0], [1], [0, 0, 1, 1], [], []>} : vector<16x32xf32>, vector<32x32xf32>, vector<16x32xf32> -> vector<16x32xf32>
    %c0_7 = arith.constant 0 : index
    %c0_8 = arith.constant 0 : index
    %7 = vector.load %arg4[%c0_7, %c0_8] : memref<32x32xf32, #tpu.memory_space<vmem>>, vector<32x32xf32>
    %cst_9 = arith.constant dense<0.000000e+00> : vector<16x32xf32>
    %8 = tpu.matmul %0, %7, %cst_9 {dimension_numbers = #tpu.dot_dimension_numbers<[1], [0], [0], [1], [0, 0, 1, 1], [], []>} : vector<16x32xf32>, vector<32x32xf32>, vector<16x32xf32> -> vector<16x32xf32>
    %9 = tpu.iota {dimensions = array<i32: 0>} : vector<8x8xi32>
    %10 = tpu.iota {dimensions = array<i32: 1>} : vector<8x8xi32>
    %11 = arith.subi %9, %10 : vector<8x8xi32>
    %12 = math.absi %11 : vector<8x8xi32>
    %c4_i32 = arith.constant 4 : i32
    %13 = vector.broadcast %c4_i32 : i32 to vector<8x8xi32>
    %14 = arith.cmpi sle, %12, %13 : vector<8x8xi32>
    %cst_10 = arith.constant 0.000000e+00 : f32
    %cst_11 = arith.constant -1.000000e+09 : f32
    %15 = vector.broadcast %cst_10 : f32 to vector<8x8xf32>
    %16 = vector.broadcast %cst_11 : f32 to vector<8x8xf32>
    %17 = arith.select %14, %15, %16 : vector<8x8xi1>, vector<8x8xf32>
    %18 = vector.extract_strided_slice %4 {offsets = [0, 0], sizes = [8, 4], strides = [1, 1]} : vector<16x32xf32> to vector<8x4xf32>
    %19 = vector.extract_strided_slice %6 {offsets = [0, 0], sizes = [8, 4], strides = [1, 1]} : vector<16x32xf32> to vector<8x4xf32>
    %20 = vector.extract_strided_slice %8 {offsets = [0, 0], sizes = [8, 4], strides = [1, 1]} : vector<16x32xf32> to vector<8x4xf32>
    %cst_12 = arith.constant dense<0.000000e+00> : vector<8x8xf32>
    %21 = tpu.matmul %18, %19, %cst_12 {dimension_numbers = #tpu.dot_dimension_numbers<[1], [1], [0], [0], [0, 0, 1, 0], [], []>} : vector<8x4xf32>, vector<8x4xf32>, vector<8x8xf32> -> vector<8x8xf32>
    %22 = arith.addf %21, %17 : vector<8x8xf32>
    %cst_13 = arith.constant dense<0xFF800000> : vector<8xf32>
    %23 = vector.multi_reduction <maximumf>, %22, %cst_13 [1] : vector<8x8xf32> to vector<8xf32>
    %24 = vector.shape_cast %23 : vector<8xf32> to vector<8x1xf32>
    %25 = vector.broadcast %24 : vector<8x1xf32> to vector<8x8xf32>
    %26 = arith.subf %22, %25 : vector<8x8xf32>
    %27 = math.exp %26 : vector<8x8xf32>
    %cst_14 = arith.constant dense<0.000000e+00> : vector<8xf32>
    %28 = vector.multi_reduction <add>, %27, %cst_14 [1] : vector<8x8xf32> to vector<8xf32>
    %29 = vector.shape_cast %28 : vector<8xf32> to vector<8x1xf32>
    %30 = tpu.reciprocal %29 {approx = true} : vector<8x1xf32> -> vector<8x1xf32>
    %31 = vector.broadcast %30 : vector<8x1xf32> to vector<8x8xf32>
    %32 = arith.mulf %27, %31 : vector<8x8xf32>
    %cst_15 = arith.constant dense<0.000000e+00> : vector<8x4xf32>
    %33 = tpu.matmul %32, %20, %cst_15 {dimension_numbers = #tpu.dot_dimension_numbers<[1], [0], [0], [1], [0, 0, 1, 1], [], []>} : vector<8x8xf32>, vector<8x4xf32>, vector<8x4xf32> -> vector<8x4xf32>
    %c0_16 = arith.constant 0 : index
    %c0_17 = arith.constant 0 : index
    %34 = vector.load %arg8[%c0_16, %c0_17] : memref<16x32xf32, #tpu.memory_space<vmem>>, vector<8x4xf32>
    tpu.vector_store %arg8[%c0_16, %c0_17], %33 {strides = array<i32>} : memref<16x32xf32, #tpu.memory_space<vmem>>, vector<8x4xf32>,
    %35 = vector.extract_strided_slice %4 {offsets = [0, 4], sizes = [8, 4], strides = [1, 1]} : vector<16x32xf32> to vector<8x4xf32>
    %36 = vector.extract_strided_slice %6 {offsets = [0, 4], sizes = [8, 4], strides = [1, 1]} : vector<16x32xf32> to vector<8x4xf32>
    %37 = vector.extract_strided_slice %8 {offsets = [0, 4], sizes = [8, 4], strides = [1, 1]} : vector<16x32xf32> to vector<8x4xf32>
    %cst_18 = arith.constant dense<0.000000e+00> : vector<8x8xf32>
    %38 = tpu.matmul %35, %36, %cst_18 {dimension_numbers = #tpu.dot_dimension_numbers<[1], [1], [0], [0], [0, 0, 1, 0], [], []>} : vector<8x4xf32>, vector<8x4xf32>, vector<8x8xf32> -> vector<8x8xf32>
    %39 = arith.addf %38, %17 : vector<8x8xf32>
    %cst_19 = arith.constant dense<0xFF800000> : vector<8xf32>
    %40 = vector.multi_reduction <maximumf>, %39, %cst_19 [1] : vector<8x8xf32> to vector<8xf32>
    %41 = vector.shape_cast %40 : vector<8xf32> to vector<8x1xf32>
    %42 = vector.broadcast %41 : vector<8x1xf32> to vector<8x8xf32>
    %43 = arith.subf %39, %42 : vector<8x8xf32>
    %44 = math.exp %43 : vector<8x8xf32>
    %cst_20 = arith.constant dense<0.000000e+00> : vector<8xf32>
    %45 = vector.multi_reduction <add>, %44, %cst_20 [1] : vector<8x8xf32> to vector<8xf32>
    %46 = vector.shape_cast %45 : vector<8xf32> to vector<8x1xf32>
    %47 = tpu.reciprocal %46 {approx = true} : vector<8x1xf32> -> vector<8x1xf32>
    %48 = vector.broadcast %47 : vector<8x1xf32> to vector<8x8xf32>
    %49 = arith.mulf %44, %48 : vector<8x8xf32>
    %cst_21 = arith.constant dense<0.000000e+00> : vector<8x4xf32>
    %50 = tpu.matmul %49, %37, %cst_21 {dimension_numbers = #tpu.dot_dimension_numbers<[1], [0], [0], [1], [0, 0, 1, 1], [], []>} : vector<8x8xf32>, vector<8x4xf32>, vector<8x4xf32> -> vector<8x4xf32>
    %c0_22 = arith.constant 0 : index
    %c4 = arith.constant 4 : index
    %51 = vector.load %arg8[%c0_22, %c4] : memref<16x32xf32, #tpu.memory_space<vmem>>, vector<8x4xf32>
    tpu.vector_store %arg8[%c0_22, %c4], %50 {strides = array<i32>} : memref<16x32xf32, #tpu.memory_space<vmem>>, vector<8x4xf32>,
    %52 = vector.extract_strided_slice %4 {offsets = [0, 8], sizes = [8, 4], strides = [1, 1]} : vector<16x32xf32> to vector<8x4xf32>
    %53 = vector.extract_strided_slice %6 {offsets = [0, 8], sizes = [8, 4], strides = [1, 1]} : vector<16x32xf32> to vector<8x4xf32>
    %54 = vector.extract_strided_slice %8 {offsets = [0, 8], sizes = [8, 4], strides = [1, 1]} : vector<16x32xf32> to vector<8x4xf32>
    %cst_23 = arith.constant dense<0.000000e+00> : vector<8x8xf32>
    %55 = tpu.matmul %52, %53, %cst_23 {dimension_numbers = #tpu.dot_dimension_numbers<[1], [1], [0], [0], [0, 0, 1, 0], [], []>} : vector<8x4xf32>, vector<8x4xf32>, vector<8x8xf32> -> vector<8x8xf32>
    %56 = arith.addf %55, %17 : vector<8x8xf32>
    %cst_24 = arith.constant dense<0xFF800000> : vector<8xf32>
    %57 = vector.multi_reduction <maximumf>, %56, %cst_24 [1] : vector<8x8xf32> to vector<8xf32>
    %58 = vector.shape_cast %57 : vector<8xf32> to vector<8x1xf32>
    %59 = vector.broadcast %58 : vector<8x1xf32> to vector<8x8xf32>
    %60 = arith.subf %56, %59 : vector<8x8xf32>
    %61 = math.exp %60 : vector<8x8xf32>
    %cst_25 = arith.constant dense<0.000000e+00> : vector<8xf32>
    %62 = vector.multi_reduction <add>, %61, %cst_25 [1] : vector<8x8xf32> to vector<8xf32>
    %63 = vector.shape_cast %62 : vector<8xf32> to vector<8x1xf32>
    %64 = tpu.reciprocal %63 {approx = true} : vector<8x1xf32> -> vector<8x1xf32>
    %65 = vector.broadcast %64 : vector<8x1xf32> to vector<8x8xf32>
    %66 = arith.mulf %61, %65 : vector<8x8xf32>
    %cst_26 = arith.constant dense<0.000000e+00> : vector<8x4xf32>
    %67 = tpu.matmul %66, %54, %cst_26 {dimension_numbers = #tpu.dot_dimension_numbers<[1], [0], [0], [1], [0, 0, 1, 1], [], []>} : vector<8x8xf32>, vector<8x4xf32>, vector<8x4xf32> -> vector<8x4xf32>
    %c0_27 = arith.constant 0 : index
    %c8 = arith.constant 8 : index
    %68 = vector.load %arg8[%c0_27, %c8] : memref<16x32xf32, #tpu.memory_space<vmem>>, vector<8x4xf32>
    tpu.vector_store %arg8[%c0_27, %c8], %67 {strides = array<i32>} : memref<16x32xf32, #tpu.memory_space<vmem>>, vector<8x4xf32>,
    %69 = vector.extract_strided_slice %4 {offsets = [0, 12], sizes = [8, 4], strides = [1, 1]} : vector<16x32xf32> to vector<8x4xf32>
    %70 = vector.extract_strided_slice %6 {offsets = [0, 12], sizes = [8, 4], strides = [1, 1]} : vector<16x32xf32> to vector<8x4xf32>
    %71 = vector.extract_strided_slice %8 {offsets = [0, 12], sizes = [8, 4], strides = [1, 1]} : vector<16x32xf32> to vector<8x4xf32>
    %cst_28 = arith.constant dense<0.000000e+00> : vector<8x8xf32>
    %72 = tpu.matmul %69, %70, %cst_28 {dimension_numbers = #tpu.dot_dimension_numbers<[1], [1], [0], [0], [0, 0, 1, 0], [], []>} : vector<8x4xf32>, vector<8x4xf32>, vector<8x8xf32> -> vector<8x8xf32>
    %73 = arith.addf %72, %17 : vector<8x8xf32>
    %cst_29 = arith.constant dense<0xFF800000> : vector<8xf32>
    %74 = vector.multi_reduction <maximumf>, %73, %cst_29 [1] : vector<8x8xf32> to vector<8xf32>
    %75 = vector.shape_cast %74 : vector<8xf32> to vector<8x1xf32>
    %76 = vector.broadcast %75 : vector<8x1xf32> to vector<8x8xf32>
    %77 = arith.subf %73, %76 : vector<8x8xf32>
    %78 = math.exp %77 : vector<8x8xf32>
    %cst_30 = arith.constant dense<0.000000e+00> : vector<8xf32>
    %79 = vector.multi_reduction <add>, %78, %cst_30 [1] : vector<8x8xf32> to vector<8xf32>
    %80 = vector.shape_cast %79 : vector<8xf32> to vector<8x1xf32>
    %81 = tpu.reciprocal %80 {approx = true} : vector<8x1xf32> -> vector<8x1xf32>
    %82 = vector.broadcast %81 : vector<8x1xf32> to vector<8x8xf32>
    %83 = arith.mulf %78, %82 : vector<8x8xf32>
    %cst_31 = arith.constant dense<0.000000e+00> : vector<8x4xf32>
    %84 = tpu.matmul %83, %71, %cst_31 {dimension_numbers = #tpu.dot_dimension_numbers<[1], [0], [0], [1], [0, 0, 1, 1], [], []>} : vector<8x8xf32>, vector<8x4xf32>, vector<8x4xf32> -> vector<8x4xf32>
    %c0_32 = arith.constant 0 : index
    %c12 = arith.constant 12 : index
    %85 = vector.load %arg8[%c0_32, %c12] : memref<16x32xf32, #tpu.memory_space<vmem>>, vector<8x4xf32>
    tpu.vector_store %arg8[%c0_32, %c12], %84 {strides = array<i32>} : memref<16x32xf32, #tpu.memory_space<vmem>>, vector<8x4xf32>,
    %86 = vector.extract_strided_slice %4 {offsets = [0, 16], sizes = [8, 4], strides = [1, 1]} : vector<16x32xf32> to vector<8x4xf32>
    %87 = vector.extract_strided_slice %6 {offsets = [0, 16], sizes = [8, 4], strides = [1, 1]} : vector<16x32xf32> to vector<8x4xf32>
    %88 = vector.extract_strided_slice %8 {offsets = [0, 16], sizes = [8, 4], strides = [1, 1]} : vector<16x32xf32> to vector<8x4xf32>
    %cst_33 = arith.constant dense<0.000000e+00> : vector<8x8xf32>
    %89 = tpu.matmul %86, %87, %cst_33 {dimension_numbers = #tpu.dot_dimension_numbers<[1], [1], [0], [0], [0, 0, 1, 0], [], []>} : vector<8x4xf32>, vector<8x4xf32>, vector<8x8xf32> -> vector<8x8xf32>
    %90 = arith.addf %89, %17 : vector<8x8xf32>
    %cst_34 = arith.constant dense<0xFF800000> : vector<8xf32>
    %91 = vector.multi_reduction <maximumf>, %90, %cst_34 [1] : vector<8x8xf32> to vector<8xf32>
    %92 = vector.shape_cast %91 : vector<8xf32> to vector<8x1xf32>
    %93 = vector.broadcast %92 : vector<8x1xf32> to vector<8x8xf32>
    %94 = arith.subf %90, %93 : vector<8x8xf32>
    %95 = math.exp %94 : vector<8x8xf32>
    %cst_35 = arith.constant dense<0.000000e+00> : vector<8xf32>
    %96 = vector.multi_reduction <add>, %95, %cst_35 [1] : vector<8x8xf32> to vector<8xf32>
    %97 = vector.shape_cast %96 : vector<8xf32> to vector<8x1xf32>
    %98 = tpu.reciprocal %97 {approx = true} : vector<8x1xf32> -> vector<8x1xf32>
    %99 = vector.broadcast %98 : vector<8x1xf32> to vector<8x8xf32>
    %100 = arith.mulf %95, %99 : vector<8x8xf32>
    %cst_36 = arith.constant dense<0.000000e+00> : vector<8x4xf32>
    %101 = tpu.matmul %100, %88, %cst_36 {dimension_numbers = #tpu.dot_dimension_numbers<[1], [0], [0], [1], [0, 0, 1, 1], [], []>} : vector<8x8xf32>, vector<8x4xf32>, vector<8x4xf32> -> vector<8x4xf32>
    %c0_37 = arith.constant 0 : index
    %c16 = arith.constant 16 : index
    %102 = vector.load %arg8[%c0_37, %c16] : memref<16x32xf32, #tpu.memory_space<vmem>>, vector<8x4xf32>
    tpu.vector_store %arg8[%c0_37, %c16], %101 {strides = array<i32>} : memref<16x32xf32, #tpu.memory_space<vmem>>, vector<8x4xf32>,
    %103 = vector.extract_strided_slice %4 {offsets = [0, 20], sizes = [8, 4], strides = [1, 1]} : vector<16x32xf32> to vector<8x4xf32>
    %104 = vector.extract_strided_slice %6 {offsets = [0, 20], sizes = [8, 4], strides = [1, 1]} : vector<16x32xf32> to vector<8x4xf32>
    %105 = vector.extract_strided_slice %8 {offsets = [0, 20], sizes = [8, 4], strides = [1, 1]} : vector<16x32xf32> to vector<8x4xf32>
    %cst_38 = arith.constant dense<0.000000e+00> : vector<8x8xf32>
    %106 = tpu.matmul %103, %104, %cst_38 {dimension_numbers = #tpu.dot_dimension_numbers<[1], [1], [0], [0], [0, 0, 1, 0], [], []>} : vector<8x4xf32>, vector<8x4xf32>, vector<8x8xf32> -> vector<8x8xf32>
    %107 = arith.addf %106, %17 : vector<8x8xf32>
    %cst_39 = arith.constant dense<0xFF800000> : vector<8xf32>
    %108 = vector.multi_reduction <maximumf>, %107, %cst_39 [1] : vector<8x8xf32> to vector<8xf32>
    %109 = vector.shape_cast %108 : vector<8xf32> to vector<8x1xf32>
    %110 = vector.broadcast %109 : vector<8x1xf32> to vector<8x8xf32>
    %111 = arith.subf %107, %110 : vector<8x8xf32>
    %112 = math.exp %111 : vector<8x8xf32>
    %cst_40 = arith.constant dense<0.000000e+00> : vector<8xf32>
    %113 = vector.multi_reduction <add>, %112, %cst_40 [1] : vector<8x8xf32> to vector<8xf32>
    %114 = vector.shape_cast %113 : vector<8xf32> to vector<8x1xf32>
    %115 = tpu.reciprocal %114 {approx = true} : vector<8x1xf32> -> vector<8x1xf32>
    %116 = vector.broadcast %115 : vector<8x1xf32> to vector<8x8xf32>
    %117 = arith.mulf %112, %116 : vector<8x8xf32>
    %cst_41 = arith.constant dense<0.000000e+00> : vector<8x4xf32>
    %118 = tpu.matmul %117, %105, %cst_41 {dimension_numbers = #tpu.dot_dimension_numbers<[1], [0], [0], [1], [0, 0, 1, 1], [], []>} : vector<8x8xf32>, vector<8x4xf32>, vector<8x4xf32> -> vector<8x4xf32>
    %c0_42 = arith.constant 0 : index
    %c20 = arith.constant 20 : index
    %119 = vector.load %arg8[%c0_42, %c20] : memref<16x32xf32, #tpu.memory_space<vmem>>, vector<8x4xf32>
    tpu.vector_store %arg8[%c0_42, %c20], %118 {strides = array<i32>} : memref<16x32xf32, #tpu.memory_space<vmem>>, vector<8x4xf32>,
    %120 = vector.extract_strided_slice %4 {offsets = [0, 24], sizes = [8, 4], strides = [1, 1]} : vector<16x32xf32> to vector<8x4xf32>
    %121 = vector.extract_strided_slice %6 {offsets = [0, 24], sizes = [8, 4], strides = [1, 1]} : vector<16x32xf32> to vector<8x4xf32>
    %122 = vector.extract_strided_slice %8 {offsets = [0, 24], sizes = [8, 4], strides = [1, 1]} : vector<16x32xf32> to vector<8x4xf32>
    %cst_43 = arith.constant dense<0.000000e+00> : vector<8x8xf32>
    %123 = tpu.matmul %120, %121, %cst_43 {dimension_numbers = #tpu.dot_dimension_numbers<[1], [1], [0], [0], [0, 0, 1, 0], [], []>} : vector<8x4xf32>, vector<8x4xf32>, vector<8x8xf32> -> vector<8x8xf32>
    %124 = arith.addf %123, %17 : vector<8x8xf32>
    %cst_44 = arith.constant dense<0xFF800000> : vector<8xf32>
    %125 = vector.multi_reduction <maximumf>, %124, %cst_44 [1] : vector<8x8xf32> to vector<8xf32>
    %126 = vector.shape_cast %125 : vector<8xf32> to vector<8x1xf32>
    %127 = vector.broadcast %126 : vector<8x1xf32> to vector<8x8xf32>
    %128 = arith.subf %124, %127 : vector<8x8xf32>
    %129 = math.exp %128 : vector<8x8xf32>
    %cst_45 = arith.constant dense<0.000000e+00> : vector<8xf32>
    %130 = vector.multi_reduction <add>, %129, %cst_45 [1] : vector<8x8xf32> to vector<8xf32>
    %131 = vector.shape_cast %130 : vector<8xf32> to vector<8x1xf32>
    %132 = tpu.reciprocal %131 {approx = true} : vector<8x1xf32> -> vector<8x1xf32>
    %133 = vector.broadcast %132 : vector<8x1xf32> to vector<8x8xf32>
    %134 = arith.mulf %129, %133 : vector<8x8xf32>
    %cst_46 = arith.constant dense<0.000000e+00> : vector<8x4xf32>
    %135 = tpu.matmul %134, %122, %cst_46 {dimension_numbers = #tpu.dot_dimension_numbers<[1], [0], [0], [1], [0, 0, 1, 1], [], []>} : vector<8x8xf32>, vector<8x4xf32>, vector<8x4xf32> -> vector<8x4xf32>
    %c0_47 = arith.constant 0 : index
    %c24 = arith.constant 24 : index
    %136 = vector.load %arg8[%c0_47, %c24] : memref<16x32xf32, #tpu.memory_space<vmem>>, vector<8x4xf32>
    tpu.vector_store %arg8[%c0_47, %c24], %135 {strides = array<i32>} : memref<16x32xf32, #tpu.memory_space<vmem>>, vector<8x4xf32>,
    %137 = vector.extract_strided_slice %4 {offsets = [0, 28], sizes = [8, 4], strides = [1, 1]} : vector<16x32xf32> to vector<8x4xf32>
    %138 = vector.extract_strided_slice %6 {offsets = [0, 28], sizes = [8, 4], strides = [1, 1]} : vector<16x32xf32> to vector<8x4xf32>
    %139 = vector.extract_strided_slice %8 {offsets = [0, 28], sizes = [8, 4], strides = [1, 1]} : vector<16x32xf32> to vector<8x4xf32>
    %cst_48 = arith.constant dense<0.000000e+00> : vector<8x8xf32>
    %140 = tpu.matmul %137, %138, %cst_48 {dimension_numbers = #tpu.dot_dimension_numbers<[1], [1], [0], [0], [0, 0, 1, 0], [], []>} : vector<8x4xf32>, vector<8x4xf32>, vector<8x8xf32> -> vector<8x8xf32>
    %141 = arith.addf %140, %17 : vector<8x8xf32>
    %cst_49 = arith.constant dense<0xFF800000> : vector<8xf32>
    %142 = vector.multi_reduction <maximumf>, %141, %cst_49 [1] : vector<8x8xf32> to vector<8xf32>
    %143 = vector.shape_cast %142 : vector<8xf32> to vector<8x1xf32>
    %144 = vector.broadcast %143 : vector<8x1xf32> to vector<8x8xf32>
    %145 = arith.subf %141, %144 : vector<8x8xf32>
    %146 = math.exp %145 : vector<8x8xf32>
    %cst_50 = arith.constant dense<0.000000e+00> : vector<8xf32>
    %147 = vector.multi_reduction <add>, %146, %cst_50 [1] : vector<8x8xf32> to vector<8xf32>
    %148 = vector.shape_cast %147 : vector<8xf32> to vector<8x1xf32>
    %149 = tpu.reciprocal %148 {approx = true} : vector<8x1xf32> -> vector<8x1xf32>
    %150 = vector.broadcast %149 : vector<8x1xf32> to vector<8x8xf32>
    %151 = arith.mulf %146, %150 : vector<8x8xf32>
    %cst_51 = arith.constant dense<0.000000e+00> : vector<8x4xf32>
    %152 = tpu.matmul %151, %139, %cst_51 {dimension_numbers = #tpu.dot_dimension_numbers<[1], [0], [0], [1], [0, 0, 1, 1], [], []>} : vector<8x8xf32>, vector<8x4xf32>, vector<8x4xf32> -> vector<8x4xf32>
    %c0_52 = arith.constant 0 : index
    %c28 = arith.constant 28 : index
    %153 = vector.load %arg8[%c0_52, %c28] : memref<16x32xf32, #tpu.memory_space<vmem>>, vector<8x4xf32>
    tpu.vector_store %arg8[%c0_52, %c28], %152 {strides = array<i32>} : memref<16x32xf32, #tpu.memory_space<vmem>>, vector<8x4xf32>,
    %154 = vector.extract_strided_slice %4 {offsets = [8, 0], sizes = [8, 4], strides = [1, 1]} : vector<16x32xf32> to vector<8x4xf32>
    %155 = vector.extract_strided_slice %6 {offsets = [8, 0], sizes = [8, 4], strides = [1, 1]} : vector<16x32xf32> to vector<8x4xf32>
    %156 = vector.extract_strided_slice %8 {offsets = [8, 0], sizes = [8, 4], strides = [1, 1]} : vector<16x32xf32> to vector<8x4xf32>
    %cst_53 = arith.constant dense<0.000000e+00> : vector<8x8xf32>
    %157 = tpu.matmul %154, %155, %cst_53 {dimension_numbers = #tpu.dot_dimension_numbers<[1], [1], [0], [0], [0, 0, 1, 0], [], []>} : vector<8x4xf32>, vector<8x4xf32>, vector<8x8xf32> -> vector<8x8xf32>
    %158 = arith.addf %157, %17 : vector<8x8xf32>
    %cst_54 = arith.constant dense<0xFF800000> : vector<8xf32>
    %159 = vector.multi_reduction <maximumf>, %158, %cst_54 [1] : vector<8x8xf32> to vector<8xf32>
    %160 = vector.shape_cast %159 : vector<8xf32> to vector<8x1xf32>
    %161 = vector.broadcast %160 : vector<8x1xf32> to vector<8x8xf32>
    %162 = arith.subf %158, %161 : vector<8x8xf32>
    %163 = math.exp %162 : vector<8x8xf32>
    %cst_55 = arith.constant dense<0.000000e+00> : vector<8xf32>
    %164 = vector.multi_reduction <add>, %163, %cst_55 [1] : vector<8x8xf32> to vector<8xf32>
    %165 = vector.shape_cast %164 : vector<8xf32> to vector<8x1xf32>
    %166 = tpu.reciprocal %165 {approx = true} : vector<8x1xf32> -> vector<8x1xf32>
    %167 = vector.broadcast %166 : vector<8x1xf32> to vector<8x8xf32>
    %168 = arith.mulf %163, %167 : vector<8x8xf32>
    %cst_56 = arith.constant dense<0.000000e+00> : vector<8x4xf32>
    %169 = tpu.matmul %168, %156, %cst_56 {dimension_numbers = #tpu.dot_dimension_numbers<[1], [0], [0], [1], [0, 0, 1, 1], [], []>} : vector<8x8xf32>, vector<8x4xf32>, vector<8x4xf32> -> vector<8x4xf32>
    %c8_57 = arith.constant 8 : index
    %c0_58 = arith.constant 0 : index
    %170 = vector.load %arg8[%c8_57, %c0_58] : memref<16x32xf32, #tpu.memory_space<vmem>>, vector<8x4xf32>
    tpu.vector_store %arg8[%c8_57, %c0_58], %169 {strides = array<i32>} : memref<16x32xf32, #tpu.memory_space<vmem>>, vector<8x4xf32>,
    %171 = vector.extract_strided_slice %4 {offsets = [8, 4], sizes = [8, 4], strides = [1, 1]} : vector<16x32xf32> to vector<8x4xf32>
    %172 = vector.extract_strided_slice %6 {offsets = [8, 4], sizes = [8, 4], strides = [1, 1]} : vector<16x32xf32> to vector<8x4xf32>
    %173 = vector.extract_strided_slice %8 {offsets = [8, 4], sizes = [8, 4], strides = [1, 1]} : vector<16x32xf32> to vector<8x4xf32>
    %cst_59 = arith.constant dense<0.000000e+00> : vector<8x8xf32>
    %174 = tpu.matmul %171, %172, %cst_59 {dimension_numbers = #tpu.dot_dimension_numbers<[1], [1], [0], [0], [0, 0, 1, 0], [], []>} : vector<8x4xf32>, vector<8x4xf32>, vector<8x8xf32> -> vector<8x8xf32>
    %175 = arith.addf %174, %17 : vector<8x8xf32>
    %cst_60 = arith.constant dense<0xFF800000> : vector<8xf32>
    %176 = vector.multi_reduction <maximumf>, %175, %cst_60 [1] : vector<8x8xf32> to vector<8xf32>
    %177 = vector.shape_cast %176 : vector<8xf32> to vector<8x1xf32>
    %178 = vector.broadcast %177 : vector<8x1xf32> to vector<8x8xf32>
    %179 = arith.subf %175, %178 : vector<8x8xf32>
    %180 = math.exp %179 : vector<8x8xf32>
    %cst_61 = arith.constant dense<0.000000e+00> : vector<8xf32>
    %181 = vector.multi_reduction <add>, %180, %cst_61 [1] : vector<8x8xf32> to vector<8xf32>
    %182 = vector.shape_cast %181 : vector<8xf32> to vector<8x1xf32>
    %183 = tpu.reciprocal %182 {approx = true} : vector<8x1xf32> -> vector<8x1xf32>
    %184 = vector.broadcast %183 : vector<8x1xf32> to vector<8x8xf32>
    %185 = arith.mulf %180, %184 : vector<8x8xf32>
    %cst_62 = arith.constant dense<0.000000e+00> : vector<8x4xf32>
    %186 = tpu.matmul %185, %173, %cst_62 {dimension_numbers = #tpu.dot_dimension_numbers<[1], [0], [0], [1], [0, 0, 1, 1], [], []>} : vector<8x8xf32>, vector<8x4xf32>, vector<8x4xf32> -> vector<8x4xf32>
    %c8_63 = arith.constant 8 : index
    %c4_64 = arith.constant 4 : index
    %187 = vector.load %arg8[%c8_63, %c4_64] : memref<16x32xf32, #tpu.memory_space<vmem>>, vector<8x4xf32>
    tpu.vector_store %arg8[%c8_63, %c4_64], %186 {strides = array<i32>} : memref<16x32xf32, #tpu.memory_space<vmem>>, vector<8x4xf32>,
    %188 = vector.extract_strided_slice %4 {offsets = [8, 8], sizes = [8, 4], strides = [1, 1]} : vector<16x32xf32> to vector<8x4xf32>
    %189 = vector.extract_strided_slice %6 {offsets = [8, 8], sizes = [8, 4], strides = [1, 1]} : vector<16x32xf32> to vector<8x4xf32>
    %190 = vector.extract_strided_slice %8 {offsets = [8, 8], sizes = [8, 4], strides = [1, 1]} : vector<16x32xf32> to vector<8x4xf32>
    %cst_65 = arith.constant dense<0.000000e+00> : vector<8x8xf32>
    %191 = tpu.matmul %188, %189, %cst_65 {dimension_numbers = #tpu.dot_dimension_numbers<[1], [1], [0], [0], [0, 0, 1, 0], [], []>} : vector<8x4xf32>, vector<8x4xf32>, vector<8x8xf32> -> vector<8x8xf32>
    %192 = arith.addf %191, %17 : vector<8x8xf32>
    %cst_66 = arith.constant dense<0xFF800000> : vector<8xf32>
    %193 = vector.multi_reduction <maximumf>, %192, %cst_66 [1] : vector<8x8xf32> to vector<8xf32>
    %194 = vector.shape_cast %193 : vector<8xf32> to vector<8x1xf32>
    %195 = vector.broadcast %194 : vector<8x1xf32> to vector<8x8xf32>
    %196 = arith.subf %192, %195 : vector<8x8xf32>
    %197 = math.exp %196 : vector<8x8xf32>
    %cst_67 = arith.constant dense<0.000000e+00> : vector<8xf32>
    %198 = vector.multi_reduction <add>, %197, %cst_67 [1] : vector<8x8xf32> to vector<8xf32>
    %199 = vector.shape_cast %198 : vector<8xf32> to vector<8x1xf32>
    %200 = tpu.reciprocal %199 {approx = true} : vector<8x1xf32> -> vector<8x1xf32>
    %201 = vector.broadcast %200 : vector<8x1xf32> to vector<8x8xf32>
    %202 = arith.mulf %197, %201 : vector<8x8xf32>
    %cst_68 = arith.constant dense<0.000000e+00> : vector<8x4xf32>
    %203 = tpu.matmul %202, %190, %cst_68 {dimension_numbers = #tpu.dot_dimension_numbers<[1], [0], [0], [1], [0, 0, 1, 1], [], []>} : vector<8x8xf32>, vector<8x4xf32>, vector<8x4xf32> -> vector<8x4xf32>
    %c8_69 = arith.constant 8 : index
    %c8_70 = arith.constant 8 : index
    %204 = vector.load %arg8[%c8_69, %c8_70] : memref<16x32xf32, #tpu.memory_space<vmem>>, vector<8x4xf32>
    tpu.vector_store %arg8[%c8_69, %c8_70], %203 {strides = array<i32>} : memref<16x32xf32, #tpu.memory_space<vmem>>, vector<8x4xf32>,
    %205 = vector.extract_strided_slice %4 {offsets = [8, 12], sizes = [8, 4], strides = [1, 1]} : vector<16x32xf32> to vector<8x4xf32>
    %206 = vector.extract_strided_slice %6 {offsets = [8, 12], sizes = [8, 4], strides = [1, 1]} : vector<16x32xf32> to vector<8x4xf32>
    %207 = vector.extract_strided_slice %8 {offsets = [8, 12], sizes = [8, 4], strides = [1, 1]} : vector<16x32xf32> to vector<8x4xf32>
    %cst_71 = arith.constant dense<0.000000e+00> : vector<8x8xf32>
    %208 = tpu.matmul %205, %206, %cst_71 {dimension_numbers = #tpu.dot_dimension_numbers<[1], [1], [0], [0], [0, 0, 1, 0], [], []>} : vector<8x4xf32>, vector<8x4xf32>, vector<8x8xf32> -> vector<8x8xf32>
    %209 = arith.addf %208, %17 : vector<8x8xf32>
    %cst_72 = arith.constant dense<0xFF800000> : vector<8xf32>
    %210 = vector.multi_reduction <maximumf>, %209, %cst_72 [1] : vector<8x8xf32> to vector<8xf32>
    %211 = vector.shape_cast %210 : vector<8xf32> to vector<8x1xf32>
    %212 = vector.broadcast %211 : vector<8x1xf32> to vector<8x8xf32>
    %213 = arith.subf %209, %212 : vector<8x8xf32>
    %214 = math.exp %213 : vector<8x8xf32>
    %cst_73 = arith.constant dense<0.000000e+00> : vector<8xf32>
    %215 = vector.multi_reduction <add>, %214, %cst_73 [1] : vector<8x8xf32> to vector<8xf32>
    %216 = vector.shape_cast %215 : vector<8xf32> to vector<8x1xf32>
    %217 = tpu.reciprocal %216 {approx = true} : vector<8x1xf32> -> vector<8x1xf32>
    %218 = vector.broadcast %217 : vector<8x1xf32> to vector<8x8xf32>
    %219 = arith.mulf %214, %218 : vector<8x8xf32>
    %cst_74 = arith.constant dense<0.000000e+00> : vector<8x4xf32>
    %220 = tpu.matmul %219, %207, %cst_74 {dimension_numbers = #tpu.dot_dimension_numbers<[1], [0], [0], [1], [0, 0, 1, 1], [], []>} : vector<8x8xf32>, vector<8x4xf32>, vector<8x4xf32> -> vector<8x4xf32>
    %c8_75 = arith.constant 8 : index
    %c12_76 = arith.constant 12 : index
    %221 = vector.load %arg8[%c8_75, %c12_76] : memref<16x32xf32, #tpu.memory_space<vmem>>, vector<8x4xf32>
    tpu.vector_store %arg8[%c8_75, %c12_76], %220 {strides = array<i32>} : memref<16x32xf32, #tpu.memory_space<vmem>>, vector<8x4xf32>,
    %222 = vector.extract_strided_slice %4 {offsets = [8, 16], sizes = [8, 4], strides = [1, 1]} : vector<16x32xf32> to vector<8x4xf32>
    %223 = vector.extract_strided_slice %6 {offsets = [8, 16], sizes = [8, 4], strides = [1, 1]} : vector<16x32xf32> to vector<8x4xf32>
    %224 = vector.extract_strided_slice %8 {offsets = [8, 16], sizes = [8, 4], strides = [1, 1]} : vector<16x32xf32> to vector<8x4xf32>
    %cst_77 = arith.constant dense<0.000000e+00> : vector<8x8xf32>
    %225 = tpu.matmul %222, %223, %cst_77 {dimension_numbers = #tpu.dot_dimension_numbers<[1], [1], [0], [0], [0, 0, 1, 0], [], []>} : vector<8x4xf32>, vector<8x4xf32>, vector<8x8xf32> -> vector<8x8xf32>
    %226 = arith.addf %225, %17 : vector<8x8xf32>
    %cst_78 = arith.constant dense<0xFF800000> : vector<8xf32>
    %227 = vector.multi_reduction <maximumf>, %226, %cst_78 [1] : vector<8x8xf32> to vector<8xf32>
    %228 = vector.shape_cast %227 : vector<8xf32> to vector<8x1xf32>
    %229 = vector.broadcast %228 : vector<8x1xf32> to vector<8x8xf32>
    %230 = arith.subf %226, %229 : vector<8x8xf32>
    %231 = math.exp %230 : vector<8x8xf32>
    %cst_79 = arith.constant dense<0.000000e+00> : vector<8xf32>
    %232 = vector.multi_reduction <add>, %231, %cst_79 [1] : vector<8x8xf32> to vector<8xf32>
    %233 = vector.shape_cast %232 : vector<8xf32> to vector<8x1xf32>
    %234 = tpu.reciprocal %233 {approx = true} : vector<8x1xf32> -> vector<8x1xf32>
    %235 = vector.broadcast %234 : vector<8x1xf32> to vector<8x8xf32>
    %236 = arith.mulf %231, %235 : vector<8x8xf32>
    %cst_80 = arith.constant dense<0.000000e+00> : vector<8x4xf32>
    %237 = tpu.matmul %236, %224, %cst_80 {dimension_numbers = #tpu.dot_dimension_numbers<[1], [0], [0], [1], [0, 0, 1, 1], [], []>} : vector<8x8xf32>, vector<8x4xf32>, vector<8x4xf32> -> vector<8x4xf32>
    %c8_81 = arith.constant 8 : index
    %c16_82 = arith.constant 16 : index
    %238 = vector.load %arg8[%c8_81, %c16_82] : memref<16x32xf32, #tpu.memory_space<vmem>>, vector<8x4xf32>
    tpu.vector_store %arg8[%c8_81, %c16_82], %237 {strides = array<i32>} : memref<16x32xf32, #tpu.memory_space<vmem>>, vector<8x4xf32>,
    %239 = vector.extract_strided_slice %4 {offsets = [8, 20], sizes = [8, 4], strides = [1, 1]} : vector<16x32xf32> to vector<8x4xf32>
    %240 = vector.extract_strided_slice %6 {offsets = [8, 20], sizes = [8, 4], strides = [1, 1]} : vector<16x32xf32> to vector<8x4xf32>
    %241 = vector.extract_strided_slice %8 {offsets = [8, 20], sizes = [8, 4], strides = [1, 1]} : vector<16x32xf32> to vector<8x4xf32>
    %cst_83 = arith.constant dense<0.000000e+00> : vector<8x8xf32>
    %242 = tpu.matmul %239, %240, %cst_83 {dimension_numbers = #tpu.dot_dimension_numbers<[1], [1], [0], [0], [0, 0, 1, 0], [], []>} : vector<8x4xf32>, vector<8x4xf32>, vector<8x8xf32> -> vector<8x8xf32>
    %243 = arith.addf %242, %17 : vector<8x8xf32>
    %cst_84 = arith.constant dense<0xFF800000> : vector<8xf32>
    %244 = vector.multi_reduction <maximumf>, %243, %cst_84 [1] : vector<8x8xf32> to vector<8xf32>
    %245 = vector.shape_cast %244 : vector<8xf32> to vector<8x1xf32>
    %246 = vector.broadcast %245 : vector<8x1xf32> to vector<8x8xf32>
    %247 = arith.subf %243, %246 : vector<8x8xf32>
    %248 = math.exp %247 : vector<8x8xf32>
    %cst_85 = arith.constant dense<0.000000e+00> : vector<8xf32>
    %249 = vector.multi_reduction <add>, %248, %cst_85 [1] : vector<8x8xf32> to vector<8xf32>
    %250 = vector.shape_cast %249 : vector<8xf32> to vector<8x1xf32>
    %251 = tpu.reciprocal %250 {approx = true} : vector<8x1xf32> -> vector<8x1xf32>
    %252 = vector.broadcast %251 : vector<8x1xf32> to vector<8x8xf32>
    %253 = arith.mulf %248, %252 : vector<8x8xf32>
    %cst_86 = arith.constant dense<0.000000e+00> : vector<8x4xf32>
    %254 = tpu.matmul %253, %241, %cst_86 {dimension_numbers = #tpu.dot_dimension_numbers<[1], [0], [0], [1], [0, 0, 1, 1], [], []>} : vector<8x8xf32>, vector<8x4xf32>, vector<8x4xf32> -> vector<8x4xf32>
    %c8_87 = arith.constant 8 : index
    %c20_88 = arith.constant 20 : index
    %255 = vector.load %arg8[%c8_87, %c20_88] : memref<16x32xf32, #tpu.memory_space<vmem>>, vector<8x4xf32>
    tpu.vector_store %arg8[%c8_87, %c20_88], %254 {strides = array<i32>} : memref<16x32xf32, #tpu.memory_space<vmem>>, vector<8x4xf32>,
    %256 = vector.extract_strided_slice %4 {offsets = [8, 24], sizes = [8, 4], strides = [1, 1]} : vector<16x32xf32> to vector<8x4xf32>
    %257 = vector.extract_strided_slice %6 {offsets = [8, 24], sizes = [8, 4], strides = [1, 1]} : vector<16x32xf32> to vector<8x4xf32>
    %258 = vector.extract_strided_slice %8 {offsets = [8, 24], sizes = [8, 4], strides = [1, 1]} : vector<16x32xf32> to vector<8x4xf32>
    %cst_89 = arith.constant dense<0.000000e+00> : vector<8x8xf32>
    %259 = tpu.matmul %256, %257, %cst_89 {dimension_numbers = #tpu.dot_dimension_numbers<[1], [1], [0], [0], [0, 0, 1, 0], [], []>} : vector<8x4xf32>, vector<8x4xf32>, vector<8x8xf32> -> vector<8x8xf32>
    %260 = arith.addf %259, %17 : vector<8x8xf32>
    %cst_90 = arith.constant dense<0xFF800000> : vector<8xf32>
    %261 = vector.multi_reduction <maximumf>, %260, %cst_90 [1] : vector<8x8xf32> to vector<8xf32>
    %262 = vector.shape_cast %261 : vector<8xf32> to vector<8x1xf32>
    %263 = vector.broadcast %262 : vector<8x1xf32> to vector<8x8xf32>
    %264 = arith.subf %260, %263 : vector<8x8xf32>
    %265 = math.exp %264 : vector<8x8xf32>
    %cst_91 = arith.constant dense<0.000000e+00> : vector<8xf32>
    %266 = vector.multi_reduction <add>, %265, %cst_91 [1] : vector<8x8xf32> to vector<8xf32>
    %267 = vector.shape_cast %266 : vector<8xf32> to vector<8x1xf32>
    %268 = tpu.reciprocal %267 {approx = true} : vector<8x1xf32> -> vector<8x1xf32>
    %269 = vector.broadcast %268 : vector<8x1xf32> to vector<8x8xf32>
    %270 = arith.mulf %265, %269 : vector<8x8xf32>
    %cst_92 = arith.constant dense<0.000000e+00> : vector<8x4xf32>
    %271 = tpu.matmul %270, %258, %cst_92 {dimension_numbers = #tpu.dot_dimension_numbers<[1], [0], [0], [1], [0, 0, 1, 1], [], []>} : vector<8x8xf32>, vector<8x4xf32>, vector<8x4xf32> -> vector<8x4xf32>
    %c8_93 = arith.constant 8 : index
    %c24_94 = arith.constant 24 : index
    %272 = vector.load %arg8[%c8_93, %c24_94] : memref<16x32xf32, #tpu.memory_space<vmem>>, vector<8x4xf32>
    tpu.vector_store %arg8[%c8_93, %c24_94], %271 {strides = array<i32>} : memref<16x32xf32, #tpu.memory_space<vmem>>, vector<8x4xf32>,
    %273 = vector.extract_strided_slice %4 {offsets = [8, 28], sizes = [8, 4], strides = [1, 1]} : vector<16x32xf32> to vector<8x4xf32>
    %274 = vector.extract_strided_slice %6 {offsets = [8, 28], sizes = [8, 4], strides = [1, 1]} : vector<16x32xf32> to vector<8x4xf32>
    %275 = vector.extract_strided_slice %8 {offsets = [8, 28], sizes = [8, 4], strides = [1, 1]} : vector<16x32xf32> to vector<8x4xf32>
    %cst_95 = arith.constant dense<0.000000e+00> : vector<8x8xf32>
    %276 = tpu.matmul %273, %274, %cst_95 {dimension_numbers = #tpu.dot_dimension_numbers<[1], [1], [0], [0], [0, 0, 1, 0], [], []>} : vector<8x4xf32>, vector<8x4xf32>, vector<8x8xf32> -> vector<8x8xf32>
    %277 = arith.addf %276, %17 : vector<8x8xf32>
    %cst_96 = arith.constant dense<0xFF800000> : vector<8xf32>
    %278 = vector.multi_reduction <maximumf>, %277, %cst_96 [1] : vector<8x8xf32> to vector<8xf32>
    %279 = vector.shape_cast %278 : vector<8xf32> to vector<8x1xf32>
    %280 = vector.broadcast %279 : vector<8x1xf32> to vector<8x8xf32>
    %281 = arith.subf %277, %280 : vector<8x8xf32>
    %282 = math.exp %281 : vector<8x8xf32>
    %cst_97 = arith.constant dense<0.000000e+00> : vector<8xf32>
    %283 = vector.multi_reduction <add>, %282, %cst_97 [1] : vector<8x8xf32> to vector<8xf32>
    %284 = vector.shape_cast %283 : vector<8xf32> to vector<8x1xf32>
    %285 = tpu.reciprocal %284 {approx = true} : vector<8x1xf32> -> vector<8x1xf32>
    %286 = vector.broadcast %285 : vector<8x1xf32> to vector<8x8xf32>
    %287 = arith.mulf %282, %286 : vector<8x8xf32>
    %cst_98 = arith.constant dense<0.000000e+00> : vector<8x4xf32>
    %288 = tpu.matmul %287, %275, %cst_98 {dimension_numbers = #tpu.dot_dimension_numbers<[1], [0], [0], [1], [0, 0, 1, 1], [], []>} : vector<8x8xf32>, vector<8x4xf32>, vector<8x4xf32> -> vector<8x4xf32>
    %c8_99 = arith.constant 8 : index
    %c28_100 = arith.constant 28 : index
    %289 = vector.load %arg8[%c8_99, %c28_100] : memref<16x32xf32, #tpu.memory_space<vmem>>, vector<8x4xf32>
    tpu.vector_store %arg8[%c8_99, %c28_100], %288 {strides = array<i32>} : memref<16x32xf32, #tpu.memory_space<vmem>>, vector<8x4xf32>,
    %c0_101 = arith.constant 0 : index
    %c0_102 = arith.constant 0 : index
    %290 = vector.load %arg8[%c0_101, %c0_102] : memref<16x32xf32, #tpu.memory_space<vmem>>, vector<16x32xf32>
    %c0_103 = arith.constant 0 : index
    %c0_104 = arith.constant 0 : index
    %291 = vector.load %arg5[%c0_103, %c0_104] : memref<32x32xf32, #tpu.memory_space<vmem>>, vector<32x32xf32>
    %cst_105 = arith.constant dense<0.000000e+00> : vector<16x32xf32>
    %292 = tpu.matmul %290, %291, %cst_105 {dimension_numbers = #tpu.dot_dimension_numbers<[1], [0], [0], [1], [0, 0, 1, 1], [], []>} : vector<16x32xf32>, vector<32x32xf32>, vector<16x32xf32> -> vector<16x32xf32>
    %c0_106 = arith.constant 0 : index
    %c0_107 = arith.constant 0 : index
    %293 = vector.load %arg6[%c0_106, %c0_107] : memref<1x32xf32, #tpu.memory_space<vmem>>, vector<1x32xf32>
    %294 = vector.broadcast %293 : vector<1x32xf32> to vector<16x32xf32>
    %295 = arith.addf %292, %294 : vector<16x32xf32>
    %c0_108 = arith.constant 0 : index
    %c0_109 = arith.constant 0 : index
    %296 = vector.load %arg7[%c0_108, %c0_109] : memref<16x32xf32, #tpu.memory_space<vmem>>, vector<16x32xf32>
    tpu.vector_store %arg7[%c0_108, %c0_109], %295 {strides = array<i32>} : memref<16x32xf32, #tpu.memory_space<vmem>>, vector<16x32xf32>,
    return
  }
  func.func @transform_0(%arg0: i32) -> (i32, i32) {
    %c0_i32 = arith.constant 0 : i32
    %c0_i32_0 = arith.constant 0 : i32
    return %arg0, %c0_i32 : i32, i32
  }
  func.func @transform_1(%arg0: i32) -> (i32, i32) {
    %c0_i32 = arith.constant 0 : i32
    %c0_i32_0 = arith.constant 0 : i32
    %c0_i32_1 = arith.constant 0 : i32
    return %c0_i32, %c0_i32_0 : i32, i32
  }
  func.func @transform_2(%arg0: i32) -> (i32, i32) {
    %c0_i32 = arith.constant 0 : i32
    %c0_i32_0 = arith.constant 0 : i32
    %c0_i32_1 = arith.constant 0 : i32
    return %c0_i32, %c0_i32_0 : i32, i32
  }
  func.func @transform_3(%arg0: i32) -> (i32, i32) {
    %c0_i32 = arith.constant 0 : i32
    %c0_i32_0 = arith.constant 0 : i32
    %c0_i32_1 = arith.constant 0 : i32
    return %c0_i32, %c0_i32_0 : i32, i32
  }
  func.func @transform_4(%arg0: i32) -> (i32, i32) {
    %c0_i32 = arith.constant 0 : i32
    %c0_i32_0 = arith.constant 0 : i32
    %c0_i32_1 = arith.constant 0 : i32
    return %c0_i32, %c0_i32_0 : i32, i32
  }
  func.func @transform_5(%arg0: i32) -> (i32, i32) {
    %c0_i32 = arith.constant 0 : i32
    %c0_i32_0 = arith.constant 0 : i32
    %c0_i32_1 = arith.constant 0 : i32
    return %c0_i32, %c0_i32_0 : i32, i32
  }
  func.func @transform_6(%arg0: i32) -> (i32, i32) {
    %c0_i32 = arith.constant 0 : i32
    %c0_i32_0 = arith.constant 0 : i32
    return %arg0, %c0_i32 : i32, i32
  }
}

</mosaic_0001>

<bundles_post_ra>
// kernel: tpu_custom_call.1
= control target key start
LH: loop header
LB: loop body
LE: loop exit
PB: predicated region body
PF: predicated region fallthrough
CT: control target
= control target key end

     0   :  { %11 = vsyncpa [#allocation4], 0  ;;  %s2136_s0 = inlined_call_operand.hbm [shape: f32[16,32], index: 0, kind: input, shape index: {}]   ;;  %s2137_s1 = inlined_call_operand.hbm [shape: f32[32,32], index: 1, kind: input, shape index: {}]   ;;  %s2138_s2 = inlined_call_operand.hbm [shape: f32[32,32], index: 2, kind: input, shape index: {}]   ;;  %s2139_s3 = inlined_call_operand.hbm [shape: f32[32,32], index: 3, kind: input, shape index: {}]   ;;  %s2140_s4 = inlined_call_operand.hbm [shape: f32[32,32], index: 4, kind: input, shape index: {}]   ;;  %s2141_s5 = inlined_call_operand.vmem [shape: f32[1,32], index: 5, kind: input, shape index: {}]   ;;  %s2142_s6 = inlined_call_operand.hbm [shape: f32[16,32], index: 6, kind: output, shape index: {}]  }
   0x1   :  { %12 = vsyncpa [#allocation7], 0 }
   0x2   :  { %13 = vsyncpa [#allocation10], 0 }
   0x3   :  { %14 = vsyncpa [#allocation5], 0  ;;  %s32_s23 = sshll.u32 %s2137_s1, 4  ;;  %s1693_s24 = smov [#allocation6]   ;;  %s33_s23 = int_to_ptr.hbm [resolvable:$true] %s32_s23 }
   0x4   :  { %s34_s25 = sshll.u32 %s1693_s24, 4  ;;  %s58_s28 = sshll.u32 %s2139_s3, 4  ;;  %s35_s25 = int_to_ptr.vmem [resolvable:$true] %s34_s25  ;;  %s59_s28 = int_to_ptr.hbm [resolvable:$true] %s58_s28 }
   0x5   :  { %s1694_s29 = smov 128   ;;  %s1695_s30 = smov 8  }
   0x6   :  { %40 = dma.hbm_to_vmem [thread:$0]  %s33_s23, 512, %s35_s25, [#allocation7], %s1694_s29, %s1694_s29, %s1695_s30  }
   0x7   :  { %s1696_s7 = smov [#allocation9]   ;;  %s19_s1 = sshll.u32 %s2136_s0, 4  ;;  %s20_s1 = int_to_ptr.hbm [resolvable:$true] %s19_s1 }
   0x8   :  { %s60_s8 = sshll.u32 %s1696_s7, 4  ;;  %s45_s12 = sshll.u32 %s2138_s2, 4  ;;  %s61_s8 = int_to_ptr.vmem [resolvable:$true] %s60_s8  ;;  %s46_s12 = int_to_ptr.hbm [resolvable:$true] %s45_s12 }
   0x9   :  { %66 = dma.hbm_to_vmem [thread:$0]  %s59_s28, 512, %s61_s8, [#allocation10], %s1694_s29, %s1694_s29, %s1695_s30  }
   0xa   :  { %s1697_s13 = smov [#allocation3]   ;;  %s1698_s15 = smov [#allocation8]  }
   0xb   :  { %s21_s14 = sshll.u32 %s1697_s13, 4  ;;  %s47_s0 = sshll.u32 %s1698_s15, 4  ;;  %s22_s14 = int_to_ptr.vmem [resolvable:$true] %s21_s14  ;;  %s48_s0 = int_to_ptr.vmem [resolvable:$true] %s47_s0 }
   0xc   :  { %27 = dma.hbm_to_vmem [thread:$0]  %s20_s1, 256, %s22_s14, [#allocation4], %s1694_s29, %s1694_s29, %s1695_s30  }
   0xd   :  { %s71_s18 = sshll.u32 %s2140_s4, 4  ;;  %s1699_s2 = smov [#allocation11]   ;;  %s72_s18 = int_to_ptr.hbm [resolvable:$true] %s71_s18 }
   0xe   :  { %53 = dma.hbm_to_vmem [thread:$0]  %s46_s12, 512, %s48_s0, [#allocation7], %s1694_s29, %s1694_s29, %s1695_s30  }
   0xf   :  { %s73_s19 = sshll.u32 %s1699_s2, 4  ;;  %s74_s19 = int_to_ptr.vmem [resolvable:$true] %s73_s19 }
  0x10   :  { %79 = dma.hbm_to_vmem [thread:$0]  %s72_s18, 512, %s74_s19, [#allocation10], %s1694_s29, %s1694_s29, %s1695_s30  }
  0x11   :  { %1685 = dma.done.wait [#allocation4], 256  }
  0x12   :  { %1686 = vsyncadd [#allocation4], 4294967040 }
  0x13   :  { %1687 = dma.done.wait [#allocation7], 1024  }
  0x14   :  { %1688 = vsyncadd [#allocation7], 4294966272 }
  0x15   :  { %1689 = dma.done.wait [#allocation10], 1024  }
  0x16   :  { %1690 = vsyncadd [#allocation10], 4294966272  ;;  %v107_v0 = vld [vmem:[#allocation6 + $0x18] sm:$0xff]  ;;  %v106_v2 = vld [vmem:[#allocation6 + $0x10] sm:$0xff]  ;;  %vm108_vm0 = vcmask 261120   ;;  %vm204_vm1 = vcmask 31744   ;;  %v194_v22 = vlaneseq }
  0x17   :  { %v143_v1 = vld [vmem:[#allocation8 + $0x18] sm:$0xff]  ;;  %127 = vmatpush.msra.mxu0 %v107_v0  ;;  %v142_v3 = vld [vmem:[#allocation8 + $0x10] sm:$0xff]  ;;  %v105_v4 = vld [vmem:[#allocation6 + $0x8] sm:$0xff]  ;;  %s1700_s4 = smov 120   ;;  %s1701_s20 = smov 124   ;;  %vm231_vm4 = vcmask 64512  }
  0x18   :  { %156 = vmatpush.msra.mxu1 %v143_v1  ;;  %v141_v5 = vld [vmem:[#allocation8 + $0x8] sm:$0xff]  ;;  %1435 = vmatpush.msra.mxu2 %v143_v1  ;;  %v104_v6 = vld [vmem:[#allocation6] sm:$0xff]  ;;  %v102_v8 = vld [vmem:[#allocation3] sm:$0xff]  ;;  %s1702_s21 = smov 116   ;;  %s1703_s22 = smov 108   ;;  %v195_v25 = vshrl.u32 %v194_v22, 7 }
  0x19   :  { %128 = vmatpush.msra.mxu0 %v106_v2  ;;  %v140_v7 = vld [vmem:[#allocation8] sm:$0xff]  ;;  %v103_v9 = vld [vmem:[#allocation3 + $0x8] sm:$0xff]  ;;  %v169_v11 = vld [vmem:[#allocation9 + $0x10] sm:$0xff]  ;;  %s1704_s23 = smov 112   ;;  %s1705_s24 = smov 104   ;;  %v197_v26 = vand.u32 127, %v194_v22 }
  0x1a   :  { %157 = vmatpush.msra.mxu1 %v142_v3  ;;  %1436 = vmatpush.msra.mxu2 %v142_v3  ;;  %v170_v10 = vld [vmem:[#allocation9 + $0x18] sm:$0xff]  ;;  %v168_v12 = vld [vmem:[#allocation9 + $0x8] sm:$0xff]  ;;  %v167_v13 = vld [vmem:[#allocation9] sm:$0xff]  ;;  %s1706_s25 = smov 100   ;;  %v1707_v36 = vmov -1e+09  }
  0x1b   :  { %129 = vmatpush.msra.mxu0 %v105_v4  ;;  %v198_v28 = vsub.s32 %v195_v25, %v197_v26  ;;  %s1708_s26 = smov 16   ;;  %s1709_s27 = smov 24   ;;  %vm337_vm5 = vcmask 64544   ;;  %vm408_vm6 = vcmask 97344   ;;  %vm479_vm7 = vcmask 130144  }
  0x1c   :  { %158 = vmatpush.msra.mxu1 %v141_v5  ;;  %1437 = vmatpush.msra.mxu2 %v141_v5  ;;  %s1710_s28 = smov 4   ;;  %s1711_s7 = smov 12   ;;  %vm550_vm8 = vcmask 162944   ;;  %vm621_vm9 = vcmask 195744   ;;  %vm692_vm10 = vcmask 228544   ;;  %vm763_vm11 = vcmask 261344  }
  0x1d   :  { %130 = vmatpush.msra.mxu0 %v104_v6  ;;  %v200_v30 = vsub.s32 0, %v198_v28  ;;  %vm199_vm2 = vcmp.lt.s32.totalorder %v198_v28, 0  ;;  %s1712_s8 = smov 20   ;;  %s1713_s9 = smov 28  }
  0x1e   :  { %159 = vmatpush.msra.mxu1 %v140_v7  ;;  %1379 = vmatmul.msk.f32.vlgmr.msra.gmra.mxu0 %vm108_vm0, %v102_v8  ;;  %s1714_s3 = smov [#allocation12]   ;;  %s1364_s14 = sshll.u32 %s2142_s6, 4  ;;  %s1365_s14 = int_to_ptr.hbm [resolvable:$true] %s1364_s14 }
  0x1f   :  { %1381 = vmatmul.msk.f32.vlgmr.msra.gmra.mxu1 %vm108_vm0, %v102_v8  ;;  %1438 = vmatpush.msra.mxu2 %v140_v7  ;;  %v201_v32 = vsel %vm199_vm2, %v200_v30, %v198_v28  ;;  %s1362_s11 = sshll.u32 %s1714_s3, 4  ;;  %s1363_s11 = int_to_ptr.vmem [resolvable:$true] %s1362_s11 }
  0x20   :  { %1382 = vmatmul.msk.f32.vlgmr.msra.gmra.mxu2 %vm108_vm0, %v103_v9  ;;  %vm202_vm3 = vcmp.le.s32.totalorder %v201_v32, 4 }
  0x21   :  { %183 = vmatpush.msrb.mxu2 %v170_v10  ;;  %v1833_v37 = vsel %vm202_vm3, 0.0, %v1707_v36 }
  0x23   :  { %184 = vmatpush.msrb.mxu2 %v169_v11 }
  0x25   :  { %185 = vmatpush.msrb.mxu2 %v168_v12 }
  0x26   :  { %1380 = vmatmul.msk.f32.gmra.mxu0 %vm108_vm0, %v103_v9 }
  0x27   :  { %186 = vmatpush.msrb.mxu2 %v167_v13 }
  0x28   :  { %1383 = vmatmul.msk.f32.vlgmr.msrb.gmra.mxu2 %vm108_vm0, %v102_v8 }
  0x30   :  { %1384 = vmatmul.msk.f32.gmra.mxu2 %vm108_vm0, %v103_v9 }
  0x9b   :  { %v132_v14 = vpop.f32.mrf.mxu0 }
  0x9c   :  { %v1786_v15 = vpop.f32.mrf.mxu1  ;;  %v138_v16 = vmul.f32 0.5, %v132_v14 }
  0x9d   :  { %341 = vrot.lane.b32.xlu2 %v1786_v15, %s1700_s4  ;;  %269 = vrot.lane.b32.xlu1 %v1786_v15, %s1701_s20 }
  0x9e   :  { %1385 = vmatpush.xpose.msk.msra.mxu3 %vm204_vm1, %v1786_v15  ;;  %339 = vrot.lane.b32.xlu0 %v138_v16, %s1700_s4 }
  0xa1   :  { %1386 = vmatmul.msk.f32.vlgmr.msra.gmra.mxu3 %vm204_vm1, %v138_v16 }
  0xa3   :  { %v1810_v17 = vpop.f32.mrf.mxu2  ;;  %v135_v33 = vpop.f32.mrf.mxu0 }
  0xa4   :  { %v139_v34 = vmul.f32 0.5, %v135_v33 }
  0xa5   :  { %412 = vrot.lane.b32.xlu2 %v1786_v15, %s1702_s21  ;;  %554 = vrot.lane.b32.xlu1 %v1786_v15, %s1703_s22 }
  0xab   :  { %v1814_v18 = vpop.f32.mrf.mxu2 }
  0xac   :  { %261 = vmatpush.msrb.mxu3 %v1814_v18 }
  0xad   :  { %483 = vrot.lane.b32.xlu2 %v1786_v15, %s1704_s23  ;;  %267 = vrot.lane.b32.xlu1 %v138_v16, %s1701_s20 }
  0xb3   :  { %v1879_v60 = vpop.f32.mrf.mxu2 }
  0xb4   :  { %v1461_v61 = vpack.i.bf16 %v1879_v60, %v1814_v18 }
  0xb5   :  { %625 = vrot.lane.b32.xlu2 %v1786_v15, %s1705_s24  ;;  %410 = vrot.lane.b32.xlu1 %v138_v16, %s1702_s21 }
  0xbd   :  { %481 = vrot.lane.b32.xlu2 %v138_v16, %s1704_s23  ;;  %552 = vrot.lane.b32.xlu1 %v138_v16, %s1703_s22 }
  0xc5   :  { %694 = vrot.lane.b32.xlu2 %v138_v16, %s1706_s25  ;;  %623 = vrot.lane.b32.xlu1 %v138_v16, %s1705_s24 }
  0xcd   :  { %899 = vrot.lane.b32.xlu2 %v1810_v17, %s1700_s4  ;;  %826 = vrot.lane.b32.xlu1 %v139_v34, %s1701_s20 }
  0xd5   :  { %967 = vrot.lane.b32.xlu2 %v139_v34, %s1702_s21  ;;  %897 = vrot.lane.b32.xlu1 %v139_v34, %s1700_s4 }
  0xdd   :  { %1037 = vrot.lane.b32.xlu2 %v139_v34, %s1704_s23  ;;  %1109 = vrot.lane.b32.xlu1 %v1810_v17, %s1703_s22 }
  0xe5   :  { %1249 = vrot.lane.b32.xlu2 %v1810_v17, %s1706_s25  ;;  %1179 = vrot.lane.b32.xlu1 %v1810_v17, %s1705_s24 }
  0xed   :  { %1247 = vrot.lane.b32.xlu1 %v139_v34, %s1706_s25 }
  0xf5   :  { %1462 = vrot.lane.b32.xlu1 %v1461_v61, %s1701_s20 }
  0xf7   :  { %v342_v19 = vpop.permute.xlu2 %341 }
  0xf8   :  { %1391 = vmatpush.xpose.msk.msrb.mxu1 %vm204_vm1, %v342_v19 }
  0xff   :  { %v1818_v20 = vpop.permute.xlu2 %412 }
 0x107   :  { %v484_v21 = vpop.permute.xlu2 %483 }
 0x108   :  { %1397 = vmatpush.xpose.msk.msra.mxu1 %vm204_vm1, %v484_v21 }
 0x10f   :  { %v626_v23 = vpop.permute.xlu2 %625  ;;  %v270_v24 = vpop.permute.xlu1 %269 }
 0x110   :  { %1388 = vmatpush.xpose.msk.msra.mxu3 %vm204_vm1, %v270_v24  ;;  %v340_v27 = vpop.permute.xlu0 %339 }
 0x111   :  { %1392 = vmatmul.msk.f32.vlgmr.msrb.gmra.mxu1 %vm204_vm1, %v340_v27 }
 0x112   :  { %1403 = vmatpush.xpose.msk.msrb.mxu1 %vm204_vm1, %v626_v23 }
 0x117   :  { %v1824_v29 = vpop.permute.xlu1 %554  ;;  %v482_v31 = vpop.permute.xlu2 %481 }
 0x119   :  { %1398 = vmatmul.msk.f32.vlgmr.msra.gmra.mxu1 %vm204_vm1, %v482_v31 }
 0x11a   :  { %1409 = vmatpush.xpose.msk.msra.mxu1 %vm204_vm1, %v1810_v17 }
 0x11f   :  { %v1829_v35 = vpop.permute.xlu1 %267  ;;  %v1854_v45 = vpop.permute.xlu2 %694 }
 0x124   :  { %v228_v38 = vpop.f32.mrf.mxu3 }
 0x125   :  { %v229_v39 = vadd.f32 %v228_v38, %v1833_v37 }
 0x127   :  { %v1836_v40 = vpop.permute.xlu1 %410  ;;  %v232_v41 = vsel %vm231_vm4, %v229_v39, -inf  ;;  %v900_v49 = vpop.permute.xlu2 %899 }
 0x128   :  { %233 = vmax.xlane.f32.xlu0 %v232_v41 }
 0x12f   :  { %v1841_v42 = vpop.permute.xlu1 %552  ;;  %v968_v9 = vpop.permute.xlu2 %967 }
 0x137   :  { %v624_v43 = vpop.permute.xlu1 %623  ;;  %v1038_v12 = vpop.permute.xlu2 %1037 }
 0x138   :  { %1404 = vmatmul.msk.f32.vlgmr.msrb.gmra.mxu1 %vm204_vm1, %v624_v43 }
 0x139   :  { %1415 = vmatpush.xpose.msk.msrb.mxu1 %vm204_vm1, %v900_v49 }
 0x13c   :  { %696 = vrot.lane.b32.xlu0 %v1786_v15, %s1706_s25 }
 0x13f   :  { %v1856_v46 = vpop.permute.xlu1 %826 }
 0x140   :  { %1410 = vmatmul.msk.f32.vlgmr.msra.gmra.mxu1 %vm204_vm1, %v139_v34 }
 0x147   :  { %v898_v53 = vpop.permute.xlu1 %897 }
 0x148   :  { %1416 = vmatmul.msk.f32.vlgmr.msrb.gmra.mxu1 %vm204_vm1, %v898_v53 }
 0x14f   :  { %v1110_v10 = vpop.permute.xlu1 %1109 }
 0x157   :  { %v1180_v14 = vpop.permute.xlu1 %1179 }
 0x15f   :  { %v1248_v25 = vpop.permute.xlu1 %1247 }
 0x167   :  { %v1933_v32 = vpop.permute.xlu1 %1462 }
 0x18e   :  { %v364_v44 = vpop.f32.mrf.mxu1 }
 0x18f   :  { %v365_v62 = vadd.f32 %v364_v44, %v1833_v37 }
 0x191   :  { %v367_v63 = vsel %vm231_vm4, %v365_v62, -inf }
 0x196   :  { %v506_v47 = vpop.f32.mrf.mxu1 }
 0x197   :  { %v1859_v48 = vadd.f32 %v506_v47, %v1833_v37 }
 0x199   :  { %v509_v50 = vsel %vm231_vm4, %v1859_v48, -inf }
 0x19a   :  { %510 = vmax.xlane.f32.xlu2 %v509_v50 }
 0x19b   :  { %v234_v51 = vpop.xlane.xlu0 %233 }
 0x19c   :  { %v235_v52 = vsub.f32 %v229_v39, %v234_v51 }
 0x19e   :  { %v236_v54 = vmul.f32 1.442695, %v235_v52 }
 0x1a0   :  { %1477 = vpow2.f32 %v236_v54 }
 0x1a6   :  { %v1478_v55 = vpop.eup %1477 }
 0x1a7   :  { %v238_v56 = vsel %vm231_vm4, %v1478_v55, 0.0 }
 0x1a8   :  { %239 = vadd.xlane.f32.xlu0 %v238_v56 }
 0x1ae   :  { %v697_v0 = vpop.permute.xlu0 %696 }
 0x1b5   :  { %v648_v57 = vpop.f32.mrf.mxu1 }
 0x1b6   :  { %v1867_v58 = vadd.f32 %v648_v57, %v1833_v37 }
 0x1b8   :  { %v651_v59 = vsel %vm231_vm4, %v1867_v58, -inf }
 0x1b9   :  { %652 = vmax.xlane.f32.xlu2 %v651_v59 }
 0x1bc   :  { %828 = vrot.lane.b32.xlu0 %v1810_v17, %s1701_s20 }
 0x1bd   :  { %v788_v1 = vpop.f32.mrf.mxu1 }
 0x1be   :  { %v1917_v16 = vadd.f32 %v788_v1, %v1833_v37 }
 0x1c0   :  { %v791_v19 = vsel %vm231_vm4, %v1917_v16, -inf }
 0x1c4   :  { %969 = vrot.lane.b32.xlu0 %v1810_v17, %s1702_s21 }
 0x1c5   :  { %v922_v3 = vpop.f32.mrf.mxu1 }
 0x1c6   :  { %v1891_v4 = vadd.f32 %v922_v3, %v1833_v37 }
 0x1c8   :  { %v925_v5 = vsel %vm231_vm4, %v1891_v4, -inf }
 0x1c9   :  { %926 = vmax.xlane.f32.xlu1 %v925_v5 }
 0x1cc   :  { %1039 = vrot.lane.b32.xlu0 %v1810_v17, %s1704_s23  ;;  %v1250_v17 = vpop.permute.xlu2 %1249 }
 0x1d1   :  { %1467 = vrot.lane.b32.xlu2 %v1461_v61, %s1700_s4 }
 0x1d4   :  { %1107 = vrot.lane.b32.xlu0 %v139_v34, %s1703_s22 }
 0x1d9   :  { %520 = vrot.lane.b32.xlu2 %v1814_v18, %s1704_s23 }
 0x1dc   :  { %1177 = vrot.lane.b32.xlu0 %v139_v34, %s1705_s24  ;;  %v1464_v34 = vunpack.i.l.bf16 %v1933_v32 }
 0x1de   :  { %328 = vmatpush.msrb.mxu0 %v1464_v34 }
 0x206   :  { %368 = vmax.xlane.f32.xlu0 %v367_v63 }
 0x20d   :  { %v511_v21 = vpop.xlane.xlu2 %510 }
 0x20e   :  { %v512_v52 = vsub.f32 %v1859_v48, %v511_v21 }
 0x210   :  { %v513_v56 = vmul.f32 1.442695, %v512_v52 }
 0x21a   :  { %1472 = vrot.lane.b32.xlu0 %v1461_v61, %s1702_s21 }
 0x21b   :  { %v240_v2 = vpop.xlane.xlu0 %239 }
 0x21c   :  { %1479 = vrcp.f32 %v240_v2 }
 0x222   :  { %v1480_v6 = vpop.eup %1479  ;;  %591 = vrot.lane.b32.xlu0 %v1814_v18, %s1703_s22 }
 0x223   :  { %v242_v7 = vmul.f32 %v1480_v6, %v1478_v55 }
 0x225   :  { %1387 = vmatmul.msk.f32.vlgmr.msrb.gmra.mxu3 %vm231_vm4, %v242_v7 }
 0x226   :  { %1394 = vmatpush.xpose.msk.msrb.mxu3 %vm204_vm1, %v1818_v20 }
 0x22c   :  { %v653_v22 = vpop.xlane.xlu2 %652 }
 0x22d   :  { %1389 = vmatmul.msk.f32.vlgmr.msra.gmra.mxu3 %vm204_vm1, %v1829_v35 }
 0x22e   :  { %1400 = vmatpush.xpose.msk.msra.mxu3 %vm204_vm1, %v1824_v29  ;;  %v829_v8 = vpop.permute.xlu0 %828  ;;  %v654_v29 = vsub.f32 %v1867_v58, %v653_v22 }
 0x230   :  { %v655_v31 = vmul.f32 1.442695, %v654_v29 }
 0x234   :  { %v1928_v23 = vpop.permute.xlu2 %1467 }
 0x235   :  { %1395 = vmatmul.msk.f32.vlgmr.msrb.gmra.mxu3 %vm204_vm1, %v1836_v40  ;;  %v1469_v24 = vunpack.i.l.bf16 %v1928_v23 }
 0x236   :  { %1406 = vmatpush.xpose.msk.msrb.mxu3 %vm204_vm1, %v697_v0  ;;  %v970_v11 = vpop.permute.xlu0 %969 }
 0x237   :  { %399 = vmatpush.msra.mxu2 %v1469_v24 }
 0x23c   :  { %v521_v26 = vpop.permute.xlu2 %520 }
 0x23d   :  { %1401 = vmatmul.msk.f32.vlgmr.msra.gmra.mxu3 %vm204_vm1, %v1841_v42  ;;  %541 = vmatpush.msrb.mxu2 %v521_v26 }
 0x23e   :  { %1412 = vmatpush.xpose.msk.msra.mxu3 %vm204_vm1, %v829_v8  ;;  %v1040_v13 = vpop.permute.xlu0 %1039 }
 0x23f   :  { %1421 = vmatpush.xpose.msk.msra.mxu1 %vm204_vm1, %v1040_v13 }
 0x242   :  { %1422 = vmatmul.msk.f32.vlgmr.msra.gmra.mxu1 %vm204_vm1, %v1038_v12  ;;  %v927_v12 = vpop.xlane.xlu1 %926 }
 0x243   :  { %1427 = vmatpush.xpose.msk.msrb.mxu1 %vm204_vm1, %v1180_v14 }
 0x245   :  { %1407 = vmatmul.msk.f32.vlgmr.msrb.gmra.mxu3 %vm204_vm1, %v1854_v45 }
 0x246   :  { %1418 = vmatpush.xpose.msk.msrb.mxu3 %vm204_vm1, %v970_v11  ;;  %v1108_v15 = vpop.permute.xlu0 %1107 }
 0x24c   :  { %792 = vmax.xlane.f32.xlu0 %v791_v19 }
 0x24d   :  { %1413 = vmatmul.msk.f32.vlgmr.msra.gmra.mxu3 %vm204_vm1, %v1856_v46 }
 0x24e   :  { %1424 = vmatpush.xpose.msk.msra.mxu3 %vm204_vm1, %v1110_v10  ;;  %v1178_v20 = vpop.permute.xlu0 %1177 }
 0x24f   :  { %1428 = vmatmul.msk.f32.vlgmr.msrb.gmra.mxu1 %vm204_vm1, %v1178_v20 }
 0x255   :  { %1419 = vmatmul.msk.f32.vlgmr.msrb.gmra.mxu3 %vm204_vm1, %v968_v9 }
 0x256   :  { %1430 = vmatpush.xpose.msk.msrb.mxu3 %vm204_vm1, %v1250_v17 }
 0x25d   :  { %1425 = vmatmul.msk.f32.vlgmr.msra.gmra.mxu3 %vm204_vm1, %v1108_v15  ;;  %v928_v15 = vsub.f32 %v1891_v4, %v927_v12 }
 0x25f   :  { %v929_v17 = vmul.f32 1.442695, %v928_v15 }
 0x265   :  { %1431 = vmatmul.msk.f32.vlgmr.msrb.gmra.mxu3 %vm204_vm1, %v1248_v25 }
 0x279   :  { %v369_v27 = vpop.xlane.xlu0 %368 }
 0x27a   :  { %v370_v28 = vsub.f32 %v365_v62, %v369_v27 }
 0x27c   :  { %v371_v30 = vmul.f32 1.442695, %v370_v28 }
 0x27e   :  { %1481 = vpow2.f32 %v371_v30 }
 0x27f   :  { %1483 = vpow2.f32 %v655_v31 }
 0x280   :  { %1485 = vpow2.f32 %v513_v56 }
 0x284   :  { %v1935_v33 = vpop.eup %1481 }
 0x285   :  { %v373_v35 = vsel %vm231_vm4, %v1935_v33, 0.0  ;;  %v1940_v36 = vpop.eup %1483 }
 0x286   :  { %374 = vadd.xlane.f32.xlu1 %v373_v35  ;;  %v657_v39 = vsel %vm231_vm4, %v1940_v36, 0.0  ;;  %v1976_v5 = vpop.eup %1485 }
 0x287   :  { %v515_v6 = vsel %vm231_vm4, %v1976_v5, 0.0 }
 0x28c   :  { %v1942_v38 = vpop.permute.xlu0 %1472 }
 0x28d   :  { %v1474_v40 = vunpack.i.l.bf16 %v1942_v38 }
 0x28e   :  { %658 = vadd.xlane.f32.xlu1 %v657_v39 }
 0x28f   :  { %470 = vmatpush.msra.mxu0 %v1474_v40 }
 0x294   :  { %v1955_v51 = vpop.permute.xlu0 %591 }
 0x2a8   :  { %v263_v41 = vpop.f32.mrf.mxu3 }
 0x2a9   :  { %266 = vst.msk [vmem:[#allocation2] sm:$0xff] %vm204_vm1, %v263_v41 }
 0x2b0   :  { %v292_v42 = vpop.f32.mrf.mxu3 }
 0x2b1   :  { %v1959_v53 = vadd.f32 %v292_v42, %v1833_v37 }
 0x2b3   :  { %v295_v57 = vsel %vm231_vm4, %v1959_v53, -inf }
 0x2b8   :  { %v435_v43 = vpop.f32.mrf.mxu3 }
 0x2b9   :  { %v1949_v44 = vadd.f32 %v435_v43, %v1833_v37 }
 0x2bb   :  { %v438_v45 = vsel %vm231_vm4, %v1949_v44, -inf }
 0x2bc   :  { %439 = vmax.xlane.f32.xlu1 %v438_v45 }
 0x2bf   :  { %v1062_v46 = vpop.f32.mrf.mxu1  ;;  %v793_v58 = vpop.xlane.xlu0 %792 }
 0x2c0   :  { %v1063_v47 = vadd.f32 %v1062_v46, %v1833_v37  ;;  %v577_v49 = vpop.f32.mrf.mxu3  ;;  %v794_v62 = vsub.f32 %v1917_v16, %v793_v58 }
 0x2c1   :  { %v1988_v13 = vadd.f32 %v577_v49, %v1833_v37 }
 0x2c2   :  { %v1065_v50 = vsel %vm231_vm4, %v1063_v47, -inf  ;;  %v795_v2 = vmul.f32 1.442695, %v794_v62 }
 0x2c3   :  { %1066 = vmax.xlane.f32.xlu2 %v1065_v50  ;;  %v580_v16 = vsel %vm231_vm4, %v1988_v13, -inf }
 0x2c4   :  { %1487 = vpow2.f32 %v795_v2 }
 0x2c5   :  { %1489 = vpow2.f32 %v929_v17 }
 0x2c8   :  { %v719_v54 = vpop.f32.mrf.mxu3 }
 0x2c9   :  { %v1962_v55 = vadd.f32 %v719_v54, %v1833_v37 }
 0x2ca   :  { %v1980_v8 = vpop.eup %1487 }
 0x2cb   :  { %296 = vmax.xlane.f32.xlu2 %v295_v57  ;;  %v722_v59 = vsel %vm231_vm4, %v1962_v55, -inf  ;;  %v797_v9 = vsel %vm231_vm4, %v1980_v8, 0.0  ;;  %v2002_v21 = vpop.eup %1489 }
 0x2cc   :  { %v1202_v61 = vpop.f32.mrf.mxu1  ;;  %723 = vmax.xlane.f32.xlu1 %v722_v59  ;;  %v931_v4 = vsel %vm231_vm4, %v2002_v21, 0.0 }
 0x2cd   :  { %v1203_v48 = vadd.f32 %v1202_v61, %v1833_v37 }
 0x2cf   :  { %v1205_v63 = vsel %vm231_vm4, %v1203_v48, -inf }
 0x2d0   :  { %v851_v0 = vpop.f32.mrf.mxu3  ;;  %1206 = vmax.xlane.f32.xlu0 %v1205_v63 }
 0x2d1   :  { %v1972_v1 = vadd.f32 %v851_v0, %v1833_v37 }
 0x2d3   :  { %v854_v3 = vsel %vm231_vm4, %v1972_v1, -inf }
 0x2d4   :  { %855 = vmax.xlane.f32.xlu2 %v854_v3 }
 0x2d8   :  { %v992_v7 = vpop.f32.mrf.mxu3  ;;  %516 = vadd.xlane.f32.xlu0 %v515_v6 }
 0x2d9   :  { %v1996_v19 = vadd.f32 %v992_v7, %v1833_v37 }
 0x2db   :  { %v995_v20 = vsel %vm231_vm4, %v1996_v19, -inf }
 0x2e0   :  { %v1132_v10 = vpop.f32.mrf.mxu3  ;;  %798 = vadd.xlane.f32.xlu0 %v797_v9 }
 0x2e1   :  { %v1985_v11 = vadd.f32 %v1132_v10, %v1833_v37 }
 0x2e3   :  { %v1135_v14 = vsel %vm231_vm4, %v1985_v11, -inf }
 0x2e4   :  { %1136 = vmax.xlane.f32.xlu1 %v1135_v14 }
 0x2e8   :  { %581 = vmax.xlane.f32.xlu0 %v580_v16  ;;  %v1272_v30 = vpop.f32.mrf.mxu3 }
 0x2e9   :  { %v2015_v40 = vadd.f32 %v1272_v30, %v1833_v37 }
 0x2eb   :  { %v1275_v43 = vsel %vm231_vm4, %v2015_v40, -inf }
 0x2ec   :  { %733 = vrot.lane.b32.xlu2 %v1814_v18, %s1706_s25 }
 0x2f0   :  { %996 = vmax.xlane.f32.xlu0 %v995_v20 }
 0x2f8   :  { %932 = vadd.xlane.f32.xlu0 %v931_v4 }
 0x2f9   :  { %v375_v22 = vpop.xlane.xlu1 %374 }
 0x2fa   :  { %1491 = vrcp.f32 %v375_v22  ;;  %v1470_v22 = vunpack.i.h.bf16 %v1928_v23 }
 0x2fd   :  { %662 = vrot.lane.b32.xlu1 %v1814_v18, %s1705_s24 }
 0x300   :  { %v1492_v24 = vpop.eup %1491 }
 0x301   :  { %v377_v25 = vmul.f32 %v1492_v24, %v1935_v33  ;;  %v659_v31 = vpop.xlane.xlu1 %658 }
 0x303   :  { %1393 = vmatmul.msk.f32.vlgmr.msra.gmra.mxu2 %vm231_vm4, %v377_v25 }
 0x32f   :  { %v440_v45 = vpop.xlane.xlu1 %439 }
 0x330   :  { %v441_v49 = vsub.f32 %v1949_v44, %v440_v45 }
 0x332   :  { %v442_v50 = vmul.f32 1.442695, %v441_v49 }
 0x336   :  { %v1067_v26 = vpop.xlane.xlu2 %1066 }
 0x337   :  { %v1068_v27 = vsub.f32 %v1063_v47, %v1067_v26 }
 0x339   :  { %v1069_v28 = vmul.f32 1.442695, %v1068_v27 }
 0x33b   :  { %1493 = vpow2.f32 %v1069_v28 }
 0x33e   :  { %v297_v35 = vpop.xlane.xlu2 %296 }
 0x33f   :  { %v298_v33 = vsub.f32 %v1959_v53, %v297_v35  ;;  %v724_v53 = vpop.xlane.xlu1 %723 }
 0x340   :  { %v725_v58 = vsub.f32 %v1962_v55, %v724_v53 }
 0x341   :  { %v2010_v29 = vpop.eup %1493  ;;  %v299_v42 = vmul.f32 1.442695, %v298_v33 }
 0x342   :  { %v1071_v34 = vsel %vm231_vm4, %v2010_v29, 0.0  ;;  %v726_v59 = vmul.f32 1.442695, %v725_v58 }
 0x343   :  { %1072 = vadd.xlane.f32.xlu0 %v1071_v34  ;;  %v1207_v39 = vpop.xlane.xlu0 %1206 }
 0x344   :  { %v1208_v18 = vsub.f32 %v1203_v48, %v1207_v39 }
 0x346   :  { %v1209_v41 = vmul.f32 1.442695, %v1208_v18 }
 0x347   :  { %v856_v61 = vpop.xlane.xlu2 %855 }
 0x348   :  { %1495 = vpow2.f32 %v1209_v41  ;;  %v857_v0 = vsub.f32 %v1972_v1, %v856_v61 }
 0x34a   :  { %v858_v3 = vmul.f32 1.442695, %v857_v0 }
 0x34b   :  { %1276 = vmax.xlane.f32.xlu0 %v1275_v43  ;;  %v517_v46 = vpop.xlane.xlu0 %516 }
 0x34c   :  { %1497 = vrcp.f32 %v517_v46 }
 0x34d   :  { %1499 = vpow2.f32 %v299_v42 }
 0x34e   :  { %v2020_v47 = vpop.eup %1495  ;;  %1501 = vpow2.f32 %v442_v50 }
 0x34f   :  { %v1211_v37 = vsel %vm231_vm4, %v2020_v47, 0.0  ;;  %1503 = vpow2.f32 %v726_v59  ;;  %v734_v34 = vpop.permute.xlu2 %733 }
 0x350   :  { %1212 = vadd.xlane.f32.xlu2 %v1211_v37 }
 0x352   :  { %v1498_v52 = vpop.eup %1497 }
 0x353   :  { %v799_v54 = vpop.xlane.xlu0 %798  ;;  %v2025_v56 = vpop.eup %1499  ;;  %v519_v57 = vmul.f32 %v1498_v52, %v1976_v5 }
 0x354   :  { %v301_v44 = vsel %vm231_vm4, %v2025_v56, 0.0  ;;  %v2032_v62 = vpop.eup %1501 }
 0x355   :  { %1399 = vmatmul.msk.f32.vlgmr.msrb.gmra.mxu2 %vm231_vm4, %v519_v57  ;;  %v444_v55 = vsel %vm231_vm4, %v2032_v62, 0.0  ;;  %v2038_v6 = vpop.eup %1503 }
 0x356   :  { %v728_v1 = vsel %vm231_vm4, %v2038_v6, 0.0 }
 0x357   :  { %v1137_v12 = vpop.xlane.xlu1 %1136 }
 0x358   :  { %302 = vadd.xlane.f32.xlu2 %v301_v44  ;;  %v1138_v23 = vsub.f32 %v1985_v11, %v1137_v12  ;;  %v1475_v44 = vunpack.i.h.bf16 %v1942_v38 }
 0x35b   :  { %v582_v48 = vpop.xlane.xlu0 %581 }
 0x35c   :  { %v583_v63 = vsub.f32 %v1988_v13, %v582_v48 }
 0x35e   :  { %v584_v2 = vmul.f32 1.442695, %v583_v63 }
 0x360   :  { %1505 = vpow2.f32 %v584_v2  ;;  %445 = vadd.xlane.f32.xlu2 %v444_v55 }
 0x361   :  { %1507 = vrcp.f32 %v659_v31 }
 0x362   :  { %1509 = vpow2.f32 %v858_v3 }
 0x363   :  { %v997_v5 = vpop.xlane.xlu0 %996 }
 0x364   :  { %v998_v7 = vsub.f32 %v1996_v19, %v997_v5 }
 0x366   :  { %v2041_v9 = vpop.eup %1505  ;;  %v999_v10 = vmul.f32 1.442695, %v998_v7 }
 0x367   :  { %v586_v13 = vsel %vm231_vm4, %v2041_v9, 0.0  ;;  %v1508_v14 = vpop.eup %1507 }
 0x368   :  { %1511 = vpow2.f32 %v999_v10  ;;  %729 = vadd.xlane.f32.xlu2 %v728_v1  ;;  %587 = vadd.xlane.f32.xlu0 %v586_v13  ;;  %v2047_v15 = vpop.eup %1509  ;;  %v661_v17 = vmul.f32 %v1508_v14, %v1940_v36 }
 0x369   :  { %1513 = vrcp.f32 %v799_v54  ;;  %v860_v20 = vsel %vm231_vm4, %v2047_v15, 0.0  ;;  %v1465_v54 = vunpack.i.h.bf16 %v1933_v32 }
 0x36b   :  { %v933_v24 = vpop.xlane.xlu0 %932 }
 0x36c   :  { %1515 = vrcp.f32 %v933_v24 }
 0x36e   :  { %v2049_v16 = vpop.eup %1511 }
 0x36f   :  { %v663_v19 = vpop.permute.xlu1 %662  ;;  %v1001_v4 = vsel %vm231_vm4, %v2049_v16, 0.0  ;;  %v1514_v25 = vpop.eup %1513 }
 0x370   :  { %683 = vmatpush.msra.mxu2 %v663_v19  ;;  %861 = vadd.xlane.f32.xlu2 %v860_v20  ;;  %v801_v36 = vmul.f32 %v1514_v25, %v1980_v8  ;;  %v1139_v8 = vmul.f32 1.442695, %v1138_v23  ;;  %v1320_v23 = vld [vmem:[#allocation11 + $0x8] sm:$0xff] }
 0x371   :  { %1002 = vadd.xlane.f32.xlu1 %v1001_v4  ;;  %1405 = vmatmul.msk.f32.vlgmr.msra.gmra.mxu2 %vm231_vm4, %v661_v17 }
 0x372   :  { %820 = vmatpush.msrb.mxu2 %v1879_v60  ;;  %v1516_v26 = vpop.eup %1515  ;;  %1517 = vpow2.f32 %v1139_v8  ;;  %v1319_v8 = vld [vmem:[#allocation11] sm:$0xff] }
 0x373   :  { %v935_v27 = vmul.f32 %v1516_v26, %v2002_v21  ;;  %v1322_v26 = vld [vmem:[#allocation11 + $0x18] sm:$0xff] }
 0x374   :  { %957 = vmatpush.msra.mxu2 %v1470_v22  ;;  %1345 = vmatpush.msra.mxu1 %v1322_v26 }
 0x378   :  { %v2073_v30 = vpop.eup %1517 }
 0x379   :  { %1411 = vmatmul.msk.f32.vlgmr.msrb.gmra.mxu2 %vm231_vm4, %v801_v36  ;;  %v1141_v21 = vsel %vm231_vm4, %v2073_v30, 0.0 }
 0x37c   :  { %1076 = vrot.lane.b32.xlu0 %v1879_v60, %s1704_s23 }
 0x381   :  { %1417 = vmatmul.msk.f32.vlgmr.msra.gmra.mxu2 %vm231_vm4, %v935_v27  ;;  %v1321_v27 = vld [vmem:[#allocation11 + $0x10] sm:$0xff] }
 0x382   :  { %1346 = vmatpush.msra.mxu1 %v1321_v27 }
 0x384   :  { %1347 = vmatpush.msra.mxu1 %v1320_v23 }
 0x386   :  { %v401_v28 = vpop.f32.mrf.mxu2  ;;  %1348 = vmatpush.msra.mxu1 %v1319_v8 }
 0x388   :  { %1216 = vrot.lane.b32.xlu2 %v1879_v60, %s1705_s24 }
 0x38a   :  { %1146 = vrot.lane.b32.xlu1 %v1879_v60, %s1703_s22 }
 0x392   :  { %1286 = vrot.lane.b32.xlu1 %v1879_v60, %s1706_s25 }
 0x39a   :  { %405 = vrot.lane.b32.xlu1 %v401_v28, %s1695_s30 }
 0x3a6   :  { %1142 = vadd.xlane.f32.xlu0 %v1141_v21 }
 0x3b6   :  { %v1073_v31 = vpop.xlane.xlu0 %1072 }
 0x3be   :  { %v1277_v35 = vpop.xlane.xlu0 %1276 }
 0x3bf   :  { %v1278_v39 = vsub.f32 %v2015_v40, %v1277_v35 }
 0x3c1   :  { %v1279_v18 = vmul.f32 1.442695, %v1278_v39 }
 0x3c3   :  { %1519 = vpow2.f32 %v1279_v18  ;;  %v1213_v60 = vpop.xlane.xlu2 %1212 }
 0x3c9   :  { %v2078_v11 = vpop.eup %1519 }
 0x3ca   :  { %v1281_v33 = vsel %vm231_vm4, %v2078_v11, 0.0 }
 0x3cb   :  { %v303_v41 = vpop.xlane.xlu2 %302  ;;  %1282 = vadd.xlane.f32.xlu0 %v1281_v33 }
 0x3cc   :  { %1521 = vrcp.f32 %v303_v41 }
 0x3d2   :  { %v1522_v42 = vpop.eup %1521 }
 0x3d3   :  { %v446_v43 = vpop.xlane.xlu2 %445  ;;  %v305_v45 = vmul.f32 %v1522_v42, %v2025_v56 }
 0x3d4   :  { %1523 = vrcp.f32 %v446_v43 }
 0x3d5   :  { %1390 = vmatmul.msk.f32.vlgmr.msrb.gmra.mxu0 %vm231_vm4, %v305_v45 }
 0x3d6   :  { %612 = vmatpush.msrb.mxu0 %v1955_v51 }
 0x3d8   :  { %v543_v40 = vpop.f32.mrf.mxu2 }
 0x3d9   :  { %547 = vrot.lane.b32.xlu2 %v543_v40, %s1708_s26  ;;  %v1476_v40 = vld [vmem:[%s2141_s5] ss:$0 sm:$0xff] }
 0x3da   :  { %v1524_v46 = vpop.eup %1523 }
 0x3db   :  { %v448_v49 = vmul.f32 %v1524_v46, %v2032_v62  ;;  %v588_v37 = vpop.xlane.xlu0 %587  ;;  %v730_v50 = vpop.xlane.xlu2 %729 }
 0x3dc   :  { %1525 = vrcp.f32 %v588_v37 }
 0x3dd   :  { %1396 = vmatmul.msk.f32.vlgmr.msra.gmra.mxu0 %vm231_vm4, %v448_v49  ;;  %1527 = vrcp.f32 %v730_v50 }
 0x3de   :  { %754 = vmatpush.msra.mxu0 %v734_v34  ;;  %1529 = vrcp.f32 %v1073_v31 }
 0x3e2   :  { %v1526_v52 = vpop.eup %1525 }
 0x3e3   :  { %v590_v53 = vmul.f32 %v1526_v52, %v2041_v9  ;;  %v862_v51 = vpop.xlane.xlu2 %861  ;;  %v1528_v56 = vpop.eup %1527 }
 0x3e4   :  { %v1530_v57 = vpop.eup %1529  ;;  %1531 = vrcp.f32 %v862_v51  ;;  %v732_v58 = vmul.f32 %v1528_v56, %v2038_v6  ;;  %v1003_v32 = vpop.xlane.xlu1 %1002 }
 0x3e5   :  { %1402 = vmatmul.msk.f32.vlgmr.msrb.gmra.mxu0 %vm231_vm4, %v590_v53  ;;  %1533 = vrcp.f32 %v1213_v60  ;;  %v1075_v59 = vmul.f32 %v1530_v57, %v2010_v29 }
 0x3e6   :  { %887 = vmatpush.msrb.mxu0 %v1465_v54  ;;  %1535 = vrcp.f32 %v1003_v32 }
 0x3ea   :  { %v1532_v62 = vpop.eup %1531 }
 0x3eb   :  { %v1217_v48 = vpop.permute.xlu2 %1216  ;;  %v1534_v63 = vpop.eup %1533  ;;  %v864_v0 = vmul.f32 %v1532_v62, %v2047_v15 }
 0x3ec   :  { %v1215_v38 = vmul.f32 %v1534_v63, %v2020_v47  ;;  %v1536_v29 = vpop.eup %1535 }
 0x3ed   :  { %1408 = vmatmul.msk.f32.vlgmr.msra.gmra.mxu0 %vm231_vm4, %v732_v58  ;;  %v1005_v55 = vmul.f32 %v1536_v29, %v2049_v16 }
 0x3ee   :  { %v1077_v61 = vpop.permute.xlu0 %1076  ;;  %1027 = vmatpush.msra.mxu0 %v1475_v44 }
 0x3ef   :  { %1097 = vmatpush.msrb.mxu2 %v1077_v61 }
 0x3f0   :  { %1423 = vmatmul.msk.f32.vlgmr.msrb.gmra.mxu2 %vm231_vm4, %v1075_v59 }
 0x3f1   :  { %1237 = vmatpush.msra.mxu2 %v1217_v48 }
 0x3f4   :  { %v685_v2 = vpop.f32.mrf.mxu2 }
 0x3f5   :  { %689 = vrot.lane.b32.xlu2 %v685_v2, %s1709_s27  ;;  %1414 = vmatmul.msk.f32.vlgmr.msrb.gmra.mxu0 %vm231_vm4, %v864_v0 }
 0x3f8   :  { %1429 = vmatmul.msk.f32.vlgmr.msra.gmra.mxu2 %vm231_vm4, %v1215_v38 }
 0x3fc   :  { %v1147_v3 = vpop.permute.xlu1 %1146  ;;  %v822_v5 = vpop.f32.mrf.mxu2 }
 0x3fd   :  { %825 = vst.msk [vmem:[#allocation2 + $0x8] sm:$0xff] %vm204_vm1, %v822_v5  ;;  %1167 = vmatpush.msrb.mxu0 %v1147_v3 }
 0x3fe   :  { %1420 = vmatmul.msk.f32.vlgmr.msra.gmra.mxu0 %vm231_vm4, %v1005_v55 }
 0x404   :  { %v1287_v6 = vpop.permute.xlu1 %1286  ;;  %v959_v15 = vpop.f32.mrf.mxu2 }
 0x405   :  { %1307 = vmatpush.msra.mxu0 %v1287_v6 }
 0x40c   :  { %v406_v25 = vpop.permute.xlu1 %405 }
 0x419   :  { %v1143_v7 = vpop.xlane.xlu0 %1142 }
 0x41a   :  { %1537 = vrcp.f32 %v1143_v7 }
 0x420   :  { %v1538_v9 = vpop.eup %1537 }
 0x421   :  { %v1145_v47 = vmul.f32 %v1538_v9, %v2073_v30 }
 0x423   :  { %1426 = vmatmul.msk.f32.vlgmr.msrb.gmra.mxu0 %vm231_vm4, %v1145_v47 }
 0x433   :  { %v548_v36 = vpop.permute.xlu2 %547 }
 0x43e   :  { %v1283_v10 = vpop.xlane.xlu0 %1282 }
 0x43f   :  { %1539 = vrcp.f32 %v1283_v10 }
 0x445   :  { %v1540_v12 = vpop.eup %1539 }
 0x446   :  { %v1285_v1 = vmul.f32 %v1540_v12, %v2078_v11 }
 0x448   :  { %1432 = vmatmul.msk.f32.vlgmr.msra.gmra.mxu0 %vm231_vm4, %v1285_v1 }
 0x44f   :  { %v690_v21 = vpop.permute.xlu2 %689 }
 0x452   :  { %v330_v13 = vpop.f32.mrf.mxu0 }
 0x453   :  { %334 = vrot.lane.b32.xlu1 %v330_v13, %s1710_s28 }
 0x45a   :  { %v472_v14 = vpop.f32.mrf.mxu0 }
 0x45b   :  { %476 = vrot.lane.b32.xlu0 %v472_v14, %s1711_s7 }
 0x462   :  { %v614_v16 = vpop.f32.mrf.mxu0 }
 0x463   :  { %963 = vrot.lane.b32.xlu0 %v959_v15, %s1695_s30  ;;  %618 = vrot.lane.b32.xlu1 %v614_v16, %s1712_s8 }
 0x46a   :  { %v756_v17 = vpop.f32.mrf.mxu0 }
 0x46b   :  { %760 = vrot.lane.b32.xlu1 %v756_v17, %s1713_s9 }
 0x472   :  { %v889_v19 = vpop.f32.mrf.mxu0 }
 0x473   :  { %v1099_v20 = vpop.f32.mrf.mxu2 }
 0x474   :  { %1103 = vrot.lane.b32.xlu2 %v1099_v20, %s1708_s26 }
 0x47b   :  { %v1029_v4 = vpop.f32.mrf.mxu0  ;;  %v1239_v22 = vpop.f32.mrf.mxu2 }
 0x47c   :  { %1033 = vrot.lane.b32.xlu1 %v1029_v4, %s1711_s7  ;;  %893 = vrot.lane.b32.xlu2 %v889_v19, %s1710_s28 }
 0x484   :  { %1243 = vrot.lane.b32.xlu1 %v1239_v22, %s1709_s27 }
 0x4a0   :  { %v1169_v24 = vpop.f32.mrf.mxu0 }
 0x4a1   :  { %1173 = vrot.lane.b32.xlu0 %v1169_v24, %s1712_s8 }
 0x4c5   :  { %v335_v28 = vpop.permute.xlu1 %334  ;;  %v1309_v30 = vpop.f32.mrf.mxu0 }
 0x4c6   :  { %338 = vst.msk [vmem:[#allocation2] sm:$0xff] %vm337_vm5, %v335_v28  ;;  %1313 = vrot.lane.b32.xlu2 %v1309_v30, %s1713_s9 }
 0x4c7   :  { %409 = vst.msk [vmem:[#allocation2] sm:$0xff] %vm408_vm6, %v406_v25 }
 0x4cd   :  { %v477_v31 = vpop.permute.xlu0 %476 }
 0x4ce   :  { %480 = vst.msk [vmem:[#allocation2] sm:$0xff] %vm479_vm7, %v477_v31  ;;  %v1104_v34 = vpop.permute.xlu2 %1103 }
 0x4cf   :  { %551 = vst.msk [vmem:[#allocation2] sm:$0xff] %vm550_vm8, %v548_v36 }
 0x4d5   :  { %v619_v35 = vpop.permute.xlu1 %618  ;;  %v964_v18 = vpop.permute.xlu0 %963 }
 0x4d6   :  { %v894_v39 = vpop.permute.xlu2 %893  ;;  %622 = vst.msk [vmem:[#allocation2] sm:$0xff] %vm621_vm9, %v619_v35 }
 0x4d7   :  { %896 = vst.msk [vmem:[#allocation2 + $0x8] sm:$0xff] %vm337_vm5, %v894_v39 }
 0x4d8   :  { %966 = vst.msk [vmem:[#allocation2 + $0x8] sm:$0xff] %vm408_vm6, %v964_v18 }
 0x4d9   :  { %693 = vst.msk [vmem:[#allocation2] sm:$0xff] %vm692_vm10, %v690_v21 }
 0x4dd   :  { %v761_v60 = vpop.permute.xlu1 %760 }
 0x4de   :  { %764 = vst.msk [vmem:[#allocation2] sm:$0xff] %vm763_vm11, %v761_v60 }
 0x4e5   :  { %v1317_v11 = vld [vmem:[#allocation2] sm:$0xff] }
 0x4e6   :  { %1433 = vmatmul.msk.f32.vlgmr.msra.gmra.mxu1 %vm108_vm0, %v1317_v11 }
 0x4ee   :  { %v1034_v33 = vpop.permute.xlu1 %1033 }
 0x4ef   :  { %1036 = vst.msk [vmem:[#allocation2 + $0x8] sm:$0xff] %vm479_vm7, %v1034_v33 }
 0x4f0   :  { %1106 = vst.msk [vmem:[#allocation2 + $0x8] sm:$0xff] %vm550_vm8, %v1104_v34 }
 0x4f6   :  { %v1244_v42 = vpop.permute.xlu1 %1243 }
 0x513   :  { %v1174_v41 = vpop.permute.xlu0 %1173 }
 0x514   :  { %1176 = vst.msk [vmem:[#allocation2 + $0x8] sm:$0xff] %vm621_vm9, %v1174_v41 }
 0x515   :  { %1246 = vst.msk [vmem:[#allocation2 + $0x8] sm:$0xff] %vm692_vm10, %v1244_v42 }
 0x520   :  { %v1314_v43 = vpop.permute.xlu2 %1313 }
 0x521   :  { %1316 = vst.msk [vmem:[#allocation2 + $0x8] sm:$0xff] %vm763_vm11, %v1314_v43 }
 0x528   :  { %v1318_v45 = vld [vmem:[#allocation2 + $0x8] sm:$0xff] }
 0x529   :  { %1434 = vmatmul.msk.f32.gmra.mxu1 %vm108_vm0, %v1318_v45 }
 0x563   :  { %v1350_v46 = vpop.f32.mrf.mxu1 }
 0x564   :  { %v1351_v49 = vadd.f32 %v1476_v40, %v1350_v46 }
 0x566   :  { %1356 = vst.msk [vmem:[#allocation12] sm:$0xff] %vm108_vm0, %v1351_v49 }
 0x5a6   :  { %v1353_v37 = vpop.f32.mrf.mxu1 }
 0x5a7   :  { %v1354_v50 = vadd.f32 %v1476_v40, %v1353_v37 }
 0x5a9   :  { %1357 = vst.msk [vmem:[#allocation12 + $0x8] sm:$0xff] %vm108_vm0, %v1354_v50 }
 0x5aa   :  { %1370 = dma.vmem_to_hbm [thread:$0]  %s1363_s11, 256, %s1365_s14, [#allocation5], %s1694_s29, %s1694_s29, %s1695_s30  }
 0x5ab   :  { %1691 = dma.done.wait [#allocation5], 256  }
 0x5ac   :  { %1692 = vsyncadd [#allocation5], 4294967040 }
 0x5ad   :  { %1375 = vsyncpa [#allocation4], 1 }
 0x5ae   :  { %1376 = vsyncpa [#allocation7], 1 }
 0x5af   :  { %1377 = vsyncpa [#allocation10], 1 }
 0x5b0   :  { %1378 = vsyncpa [#allocation5], 1 }

</bundles_post_ra>
